<compile_context>
chip_gen: v7x
topology: tpu7x:2x2x1
jax: 0.10.0
libtpu: 0.0.40
codegen_flags: <defaults>
</compile_context>

<pallas_src>
import numpy as np
import jax
import jax.numpy as jnp
from jax import lax
from jax.experimental import pallas as pl
from jax.experimental.pallas import tpu as pltpu

CHANNEL_NUM = 4
HIDDEN_LAYERS = 8                          # forward() hardcodes k in 0..2, 2..4, 4..8
F_MAX = CHANNEL_NUM + HIDDEN_LAYERS        # feature count seen by the final layer (12)
LANE = 128                                 # lane width of a pixel slab
SUB_R = 16                                 # rows per register-resident sub-chunk
MAX_TILE_ROWS = 256                        # rows (of 128 px) per grid step

W_TOTAL = 2 * sum(CHANNEL_NUM + k for k in range(HIDDEN_LAYERS)) + F_MAX   # 132
B_TOTAL = 2 * HIDDEN_LAYERS + 1                                            # 17

# Rough per-pixel cost (XLA scheduling hint only; does not affect codegen).
_FLOPS_PER_PIXEL = 4 * sum(CHANNEL_NUM + k for k in range(HIDDEN_LAYERS)) + 8 * 4 + 2 * F_MAX + 10
_BYTES_PER_PIXEL = 4 * (CHANNEL_NUM + 1)


def _make_poly_kernel(sub_r, n_chunks):
    def kernel(x_ref, w_ref, b_ref, out_ref):
        # x_ref  : (CHANNEL_NUM, tile_r, 128) VMEM -- channel-major pixel slabs
        # w_ref  : (132,) SMEM f32 -- per-layer weights, flattened, nw folded in
        # b_ref  : (17,)  SMEM f32 -- per-layer biases, flattened
        # out_ref: (tile_r, 128) VMEM

        # Hoist every SMEM scalar read out of the chunk loop (JAX does not CSE
        # these; re-reading per chunk would inflate the binding VALU/vld slots).
        w = [w_ref[i] for i in range(W_TOTAL)]
        b = [b_ref[i] for i in range(B_TOTAL)]

        def chunk(i, carry):
            r0 = i * sub_r
            if sub_r % 8 == 0:
                r0 = pl.multiple_of(r0, sub_r)
            feats = [x_ref[c, pl.ds(r0, sub_r), :] for c in range(CHANNEL_NUM)]

            w_off = 0
            b_off = 0
            for k in range(HIDDEN_LAYERS):
                fan_in = CHANNEL_NUM + k
                # o = W_k @ feats + b_k as VPU scalar-broadcast MACs; two
                # partial accumulators per output row (even/odd j) for ILP,
                # bias folded into the accumulator init.
                o0a = feats[0] * w[w_off] + b[b_off]
                o0b = feats[1] * w[w_off + 1]
                o1a = feats[0] * w[w_off + fan_in] + b[b_off + 1]
                o1b = feats[1] * w[w_off + fan_in + 1]
                for j in range(2, fan_in):
                    if j % 2 == 0:
                        o0a = o0a + feats[j] * w[w_off + j]
                        o1a = o1a + feats[j] * w[w_off + fan_in + j]
                    else:
                        o0b = o0b + feats[j] * w[w_off + j]
                        o1b = o1b + feats[j] * w[w_off + fan_in + j]
                o0 = o0a + o0b
                o1 = o1a + o1b
                if 2 <= k < 4:
                    # torch: o[..., :1] / o[..., 1:] -- EUP reciprocal + Newton.
                    inv = pl.reciprocal(o1, approx=True)
                    inv = inv * (2.0 - o1 * inv)
                    feats.append(o0 * inv)
                else:
                    # torch: o[..., :1] * o[..., 1:]
                    feats.append(o0 * o1)
                w_off += 2 * fan_in
                b_off += 2

            # Final Linear(C + 8, 1); torch returns outputs[..., 0].
            ya = feats[0] * w[w_off] + b[b_off]
            yb = feats[1] * w[w_off + 1]
            for j in range(2, F_MAX):
                if j % 2 == 0:
                    ya = ya + feats[j] * w[w_off + j]
                else:
                    yb = yb + feats[j] * w[w_off + j]
            out_ref[pl.ds(r0, sub_r), :] = ya + yb
            return carry

        lax.fori_loop(0, n_chunks, chunk, 0, unroll=True)

    return kernel


def _pick_tile_r(R, B):
    """Largest row-block dividing R that obeys the (8,128) tiling rule
    (multiple of 8, or the full extent), capped at MAX_TILE_ROWS, preferring
    >= 2 total grid steps so both v7x TensorCores get work."""
    cap = min(R, MAX_TILE_ROWS)
    cands = [t for t in range(1, cap + 1) if R % t == 0 and (t % 8 == 0 or t == R)]
    if not cands:
        return None
    if B == 1:
        split = [t for t in cands if R // t >= 2]
        if split:
            return max(split)
    return max(cands)


def _poly_pallas(x4, w_flat, b_flat):
    # x4: (B, CHANNEL_NUM, R, 128) float32  ->  (B, R, 128) float32
    B, C, R, lane = x4.shape
    assert C == CHANNEL_NUM and lane == LANE
    tile_r = _pick_tile_r(R, B)
    assert tile_r is not None
    sub_r = SUB_R if tile_r % SUB_R == 0 else (8 if tile_r % 8 == 0 else tile_r)
    n_chunks = tile_r // sub_r
    n_pixels = B * R * LANE

    return pl.pallas_call(
        _make_poly_kernel(sub_r, n_chunks),
        out_shape=jax.ShapeDtypeStruct((B, R, LANE), jnp.float32),
        grid=(B, R // tile_r),
        in_specs=[
            pl.BlockSpec((None, CHANNEL_NUM, tile_r, LANE), lambda b, r: (b, 0, r, 0)),
            pl.BlockSpec(memory_space=pltpu.MemorySpace.SMEM),
            pl.BlockSpec(memory_space=pltpu.MemorySpace.SMEM),
        ],
        out_specs=pl.BlockSpec((None, tile_r, LANE), lambda b, r: (b, r, 0)),
        compiler_params=pltpu.CompilerParams(
            dimension_semantics=("parallel", "parallel")),
        cost_estimate=pl.CostEstimate(
            flops=_FLOPS_PER_PIXEL * n_pixels,
            transcendentals=2 * n_pixels,
            bytes_accessed=_BYTES_PER_PIXEL * n_pixels),
    )(x4, w_flat, b_flat)


def poly_forward(x_nchw, w_flat, b_flat):
    """Forward pass of `poly` on an NCHW tensor; returns (B, H, W)."""
    B, C, H, W = x_nchw.shape
    assert C == CHANNEL_NUM
    hw = H * W
    x = x_nchw.astype(jnp.float32)

    if hw % LANE == 0 and _pick_tile_r(hw // LANE, B) is not None:
        # Fast path: NCHW is already channel-major per batch; reshaping to
        # (B, C, R, 128) pixel slabs is pure layout plumbing (no extra HBM pass).
        x4 = x.reshape(B, CHANNEL_NUM, hw // LANE, LANE)
        out = _poly_pallas(x4, w_flat, b_flat)
        return out.reshape(B, H, W)

    # Fallback: zero-pad the pixel axis to a multiple of 8*128.  Padded pixels
    # flow through the k=2,3 divisions with o1 = bias; they are sliced off
    # below and never participate in cross-lane ops.
    pad_to = 8 * LANE
    hw_pad = ((hw + pad_to - 1) // pad_to) * pad_to
    x_flat = jnp.pad(x.reshape(B, CHANNEL_NUM, hw), ((0, 0), (0, 0), (0, hw_pad - hw)))
    x4 = x_flat.reshape(B, CHANNEL_NUM, hw_pad // LANE, LANE)
    out = _poly_pallas(x4, w_flat, b_flat)
    return out.reshape(B, hw_pad)[:, :hw].reshape(B, H, W)


def ref_forward(x_cl, nw, Ws, bs):
    # Plain-JAX reference, mirrors torch forward() on channels-last rows (N, C).
    out = x_cl * nw[None, :]
    for k in range(HIDDEN_LAYERS):
        o = out @ Ws[k].T + bs[k][None, :]
        if 2 <= k < 4:
            new = o[:, :1] / o[:, 1:]
        else:
            new = o[:, :1] * o[:, 1:]
        out = jnp.concatenate([out, new], axis=-1)
    o = out @ Ws[-1].T + bs[-1][None, :]
    return o[:, 0]


def make_params():
    # Deterministic, non-degenerate parameters (the torch __init__ zero-fill
    # would make the k=2,3 divisions 0/0).  Biases kept in [0.5, 1.5] so the
    # denominators stay away from zero.
    keys = jax.random.split(jax.random.PRNGKey(42), 2 * (HIDDEN_LAYERS + 1))
    Ws, bs = [], []
    for k in range(HIDDEN_LAYERS):
        fan_in = CHANNEL_NUM + k
        Ws.append(0.1 * jax.random.normal(keys[2 * k], (2, fan_in), dtype=jnp.float32))
        bs.append(0.5 + jax.random.uniform(keys[2 * k + 1], (2,), dtype=jnp.float32))
    Ws.append(0.1 * jax.random.normal(keys[2 * HIDDEN_LAYERS],
                                      (1, F_MAX), dtype=jnp.float32))
    bs.append(0.5 + jax.random.uniform(keys[2 * HIDDEN_LAYERS + 1], (1,), dtype=jnp.float32))
    return Ws, bs


def pack_params(Ws, bs, nw):
    # Fold nw into the first CHANNEL_NUM weight columns of every layer
    # (exactly what module.renormalize does) and flatten everything into two
    # small 1-D f32 arrays for SMEM scalar reads.
    nw_np = np.asarray(nw, dtype=np.float32)
    w_parts, b_parts = [], []
    for Wk, bk in zip(Ws, bs):
        Wk = np.array(Wk, dtype=np.float32)
        Wk[:, :CHANNEL_NUM] *= nw_np[None, :]
        w_parts.append(Wk.reshape(-1))                       # row-major (o0 row, o1 row)
        b_parts.append(np.asarray(bk, dtype=np.float32).reshape(-1))
    w_flat = jnp.asarray(np.concatenate(w_parts))
    b_flat = jnp.asarray(np.concatenate(b_parts))
    assert w_flat.shape == (W_TOTAL,) and b_flat.shape == (B_TOTAL,)
    return w_flat, b_flat


if __name__ == "__main__":
    B, C, H, W = 2, CHANNEL_NUM, 16, 16
    x = jax.random.normal(jax.random.PRNGKey(0), (B, C, H, W), dtype=jnp.float32)  # NCHW
    nw = jnp.ones((CHANNEL_NUM,), dtype=jnp.float32)   # self._nw buffer (ones)

    Ws, bs = make_params()
    w_flat, b_flat = pack_params(Ws, bs, nw)

    y = poly_forward(x, w_flat, b_flat)                # (B, H, W)
    y = jax.block_until_ready(y)

    # Reference acts on channels-last rows (the module acts on the channel dim).
    x_cl = jnp.transpose(x, (0, 2, 3, 1)).reshape(-1, CHANNEL_NUM)
    y_ref = np.asarray(ref_forward(x_cl, nw, Ws, bs)).reshape(B, H, W)
    np.testing.assert_allclose(np.asarray(y), y_ref, rtol=2e-3, atol=2e-3)
    print("KERNEL_OK")
</pallas_src>

<mosaic_0001>
module attributes {stable_mosaic.version = 11 : i64} {
  func.func @kernel(%arg0: i32, %arg1: i32, %arg2: memref<1x4x2x128xf32, #tpu.memory_space<vmem>>, %arg3: memref<132xf32, #tpu.memory_space<smem>>, %arg4: memref<17xf32, #tpu.memory_space<smem>>, %arg5: memref<1x2x128xf32, #tpu.memory_space<vmem>>) attributes {dimension_semantics = [#tpu.dimension_semantics<parallel>, #tpu.dimension_semantics<parallel>], iteration_bounds = array<i64: 2, 1>, scalar_prefetch = 0 : i64, scratch_operands = 0 : i64, tpu.core_type = #tpu.core_type<tc>, window_params = [{transform_indices = @transform_0, window_bounds = array<i64: 1, 4, 2, 128>}, {transform_indices = @transform_1, window_bounds = array<i64: 132>}, {transform_indices = @transform_2, window_bounds = array<i64: 17>}, {transform_indices = @transform_3, window_bounds = array<i64: 1, 2, 128>}]} {
    %c0 = arith.constant 0 : index
    %0 = memref.load %arg3[%c0] : memref<132xf32, #tpu.memory_space<smem>>
    %c1 = arith.constant 1 : index
    %1 = memref.load %arg3[%c1] : memref<132xf32, #tpu.memory_space<smem>>
    %c2 = arith.constant 2 : index
    %2 = memref.load %arg3[%c2] : memref<132xf32, #tpu.memory_space<smem>>
    %c3 = arith.constant 3 : index
    %3 = memref.load %arg3[%c3] : memref<132xf32, #tpu.memory_space<smem>>
    %c4 = arith.constant 4 : index
    %4 = memref.load %arg3[%c4] : memref<132xf32, #tpu.memory_space<smem>>
    %c5 = arith.constant 5 : index
    %5 = memref.load %arg3[%c5] : memref<132xf32, #tpu.memory_space<smem>>
    %c6 = arith.constant 6 : index
    %6 = memref.load %arg3[%c6] : memref<132xf32, #tpu.memory_space<smem>>
    %c7 = arith.constant 7 : index
    %7 = memref.load %arg3[%c7] : memref<132xf32, #tpu.memory_space<smem>>
    %c8 = arith.constant 8 : index
    %8 = memref.load %arg3[%c8] : memref<132xf32, #tpu.memory_space<smem>>
    %c9 = arith.constant 9 : index
    %9 = memref.load %arg3[%c9] : memref<132xf32, #tpu.memory_space<smem>>
    %c10 = arith.constant 10 : index
    %10 = memref.load %arg3[%c10] : memref<132xf32, #tpu.memory_space<smem>>
    %c11 = arith.constant 11 : index
    %11 = memref.load %arg3[%c11] : memref<132xf32, #tpu.memory_space<smem>>
    %c12 = arith.constant 12 : index
    %12 = memref.load %arg3[%c12] : memref<132xf32, #tpu.memory_space<smem>>
    %c13 = arith.constant 13 : index
    %13 = memref.load %arg3[%c13] : memref<132xf32, #tpu.memory_space<smem>>
    %c14 = arith.constant 14 : index
    %14 = memref.load %arg3[%c14] : memref<132xf32, #tpu.memory_space<smem>>
    %c15 = arith.constant 15 : index
    %15 = memref.load %arg3[%c15] : memref<132xf32, #tpu.memory_space<smem>>
    %c16 = arith.constant 16 : index
    %16 = memref.load %arg3[%c16] : memref<132xf32, #tpu.memory_space<smem>>
    %c17 = arith.constant 17 : index
    %17 = memref.load %arg3[%c17] : memref<132xf32, #tpu.memory_space<smem>>
    %c18 = arith.constant 18 : index
    %18 = memref.load %arg3[%c18] : memref<132xf32, #tpu.memory_space<smem>>
    %c19 = arith.constant 19 : index
    %19 = memref.load %arg3[%c19] : memref<132xf32, #tpu.memory_space<smem>>
    %c20 = arith.constant 20 : index
    %20 = memref.load %arg3[%c20] : memref<132xf32, #tpu.memory_space<smem>>
    %c21 = arith.constant 21 : index
    %21 = memref.load %arg3[%c21] : memref<132xf32, #tpu.memory_space<smem>>
    %c22 = arith.constant 22 : index
    %22 = memref.load %arg3[%c22] : memref<132xf32, #tpu.memory_space<smem>>
    %c23 = arith.constant 23 : index
    %23 = memref.load %arg3[%c23] : memref<132xf32, #tpu.memory_space<smem>>
    %c24 = arith.constant 24 : index
    %24 = memref.load %arg3[%c24] : memref<132xf32, #tpu.memory_space<smem>>
    %c25 = arith.constant 25 : index
    %25 = memref.load %arg3[%c25] : memref<132xf32, #tpu.memory_space<smem>>
    %c26 = arith.constant 26 : index
    %26 = memref.load %arg3[%c26] : memref<132xf32, #tpu.memory_space<smem>>
    %c27 = arith.constant 27 : index
    %27 = memref.load %arg3[%c27] : memref<132xf32, #tpu.memory_space<smem>>
    %c28 = arith.constant 28 : index
    %28 = memref.load %arg3[%c28] : memref<132xf32, #tpu.memory_space<smem>>
    %c29 = arith.constant 29 : index
    %29 = memref.load %arg3[%c29] : memref<132xf32, #tpu.memory_space<smem>>
    %c30 = arith.constant 30 : index
    %30 = memref.load %arg3[%c30] : memref<132xf32, #tpu.memory_space<smem>>
    %c31 = arith.constant 31 : index
    %31 = memref.load %arg3[%c31] : memref<132xf32, #tpu.memory_space<smem>>
    %c32 = arith.constant 32 : index
    %32 = memref.load %arg3[%c32] : memref<132xf32, #tpu.memory_space<smem>>
    %c33 = arith.constant 33 : index
    %33 = memref.load %arg3[%c33] : memref<132xf32, #tpu.memory_space<smem>>
    %c34 = arith.constant 34 : index
    %34 = memref.load %arg3[%c34] : memref<132xf32, #tpu.memory_space<smem>>
    %c35 = arith.constant 35 : index
    %35 = memref.load %arg3[%c35] : memref<132xf32, #tpu.memory_space<smem>>
    %c36 = arith.constant 36 : index
    %36 = memref.load %arg3[%c36] : memref<132xf32, #tpu.memory_space<smem>>
    %c37 = arith.constant 37 : index
    %37 = memref.load %arg3[%c37] : memref<132xf32, #tpu.memory_space<smem>>
    %c38 = arith.constant 38 : index
    %38 = memref.load %arg3[%c38] : memref<132xf32, #tpu.memory_space<smem>>
    %c39 = arith.constant 39 : index
    %39 = memref.load %arg3[%c39] : memref<132xf32, #tpu.memory_space<smem>>
    %c40 = arith.constant 40 : index
    %40 = memref.load %arg3[%c40] : memref<132xf32, #tpu.memory_space<smem>>
    %c41 = arith.constant 41 : index
    %41 = memref.load %arg3[%c41] : memref<132xf32, #tpu.memory_space<smem>>
    %c42 = arith.constant 42 : index
    %42 = memref.load %arg3[%c42] : memref<132xf32, #tpu.memory_space<smem>>
    %c43 = arith.constant 43 : index
    %43 = memref.load %arg3[%c43] : memref<132xf32, #tpu.memory_space<smem>>
    %c44 = arith.constant 44 : index
    %44 = memref.load %arg3[%c44] : memref<132xf32, #tpu.memory_space<smem>>
    %c45 = arith.constant 45 : index
    %45 = memref.load %arg3[%c45] : memref<132xf32, #tpu.memory_space<smem>>
    %c46 = arith.constant 46 : index
    %46 = memref.load %arg3[%c46] : memref<132xf32, #tpu.memory_space<smem>>
    %c47 = arith.constant 47 : index
    %47 = memref.load %arg3[%c47] : memref<132xf32, #tpu.memory_space<smem>>
    %c48 = arith.constant 48 : index
    %48 = memref.load %arg3[%c48] : memref<132xf32, #tpu.memory_space<smem>>
    %c49 = arith.constant 49 : index
    %49 = memref.load %arg3[%c49] : memref<132xf32, #tpu.memory_space<smem>>
    %c50 = arith.constant 50 : index
    %50 = memref.load %arg3[%c50] : memref<132xf32, #tpu.memory_space<smem>>
    %c51 = arith.constant 51 : index
    %51 = memref.load %arg3[%c51] : memref<132xf32, #tpu.memory_space<smem>>
    %c52 = arith.constant 52 : index
    %52 = memref.load %arg3[%c52] : memref<132xf32, #tpu.memory_space<smem>>
    %c53 = arith.constant 53 : index
    %53 = memref.load %arg3[%c53] : memref<132xf32, #tpu.memory_space<smem>>
    %c54 = arith.constant 54 : index
    %54 = memref.load %arg3[%c54] : memref<132xf32, #tpu.memory_space<smem>>
    %c55 = arith.constant 55 : index
    %55 = memref.load %arg3[%c55] : memref<132xf32, #tpu.memory_space<smem>>
    %c56 = arith.constant 56 : index
    %56 = memref.load %arg3[%c56] : memref<132xf32, #tpu.memory_space<smem>>
    %c57 = arith.constant 57 : index
    %57 = memref.load %arg3[%c57] : memref<132xf32, #tpu.memory_space<smem>>
    %c58 = arith.constant 58 : index
    %58 = memref.load %arg3[%c58] : memref<132xf32, #tpu.memory_space<smem>>
    %c59 = arith.constant 59 : index
    %59 = memref.load %arg3[%c59] : memref<132xf32, #tpu.memory_space<smem>>
    %c60 = arith.constant 60 : index
    %60 = memref.load %arg3[%c60] : memref<132xf32, #tpu.memory_space<smem>>
    %c61 = arith.constant 61 : index
    %61 = memref.load %arg3[%c61] : memref<132xf32, #tpu.memory_space<smem>>
    %c62 = arith.constant 62 : index
    %62 = memref.load %arg3[%c62] : memref<132xf32, #tpu.memory_space<smem>>
    %c63 = arith.constant 63 : index
    %63 = memref.load %arg3[%c63] : memref<132xf32, #tpu.memory_space<smem>>
    %c64 = arith.constant 64 : index
    %64 = memref.load %arg3[%c64] : memref<132xf32, #tpu.memory_space<smem>>
    %c65 = arith.constant 65 : index
    %65 = memref.load %arg3[%c65] : memref<132xf32, #tpu.memory_space<smem>>
    %c66 = arith.constant 66 : index
    %66 = memref.load %arg3[%c66] : memref<132xf32, #tpu.memory_space<smem>>
    %c67 = arith.constant 67 : index
    %67 = memref.load %arg3[%c67] : memref<132xf32, #tpu.memory_space<smem>>
    %c68 = arith.constant 68 : index
    %68 = memref.load %arg3[%c68] : memref<132xf32, #tpu.memory_space<smem>>
    %c69 = arith.constant 69 : index
    %69 = memref.load %arg3[%c69] : memref<132xf32, #tpu.memory_space<smem>>
    %c70 = arith.constant 70 : index
    %70 = memref.load %arg3[%c70] : memref<132xf32, #tpu.memory_space<smem>>
    %c71 = arith.constant 71 : index
    %71 = memref.load %arg3[%c71] : memref<132xf32, #tpu.memory_space<smem>>
    %c72 = arith.constant 72 : index
    %72 = memref.load %arg3[%c72] : memref<132xf32, #tpu.memory_space<smem>>
    %c73 = arith.constant 73 : index
    %73 = memref.load %arg3[%c73] : memref<132xf32, #tpu.memory_space<smem>>
    %c74 = arith.constant 74 : index
    %74 = memref.load %arg3[%c74] : memref<132xf32, #tpu.memory_space<smem>>
    %c75 = arith.constant 75 : index
    %75 = memref.load %arg3[%c75] : memref<132xf32, #tpu.memory_space<smem>>
    %c76 = arith.constant 76 : index
    %76 = memref.load %arg3[%c76] : memref<132xf32, #tpu.memory_space<smem>>
    %c77 = arith.constant 77 : index
    %77 = memref.load %arg3[%c77] : memref<132xf32, #tpu.memory_space<smem>>
    %c78 = arith.constant 78 : index
    %78 = memref.load %arg3[%c78] : memref<132xf32, #tpu.memory_space<smem>>
    %c79 = arith.constant 79 : index
    %79 = memref.load %arg3[%c79] : memref<132xf32, #tpu.memory_space<smem>>
    %c80 = arith.constant 80 : index
    %80 = memref.load %arg3[%c80] : memref<132xf32, #tpu.memory_space<smem>>
    %c81 = arith.constant 81 : index
    %81 = memref.load %arg3[%c81] : memref<132xf32, #tpu.memory_space<smem>>
    %c82 = arith.constant 82 : index
    %82 = memref.load %arg3[%c82] : memref<132xf32, #tpu.memory_space<smem>>
    %c83 = arith.constant 83 : index
    %83 = memref.load %arg3[%c83] : memref<132xf32, #tpu.memory_space<smem>>
    %c84 = arith.constant 84 : index
    %84 = memref.load %arg3[%c84] : memref<132xf32, #tpu.memory_space<smem>>
    %c85 = arith.constant 85 : index
    %85 = memref.load %arg3[%c85] : memref<132xf32, #tpu.memory_space<smem>>
    %c86 = arith.constant 86 : index
    %86 = memref.load %arg3[%c86] : memref<132xf32, #tpu.memory_space<smem>>
    %c87 = arith.constant 87 : index
    %87 = memref.load %arg3[%c87] : memref<132xf32, #tpu.memory_space<smem>>
    %c88 = arith.constant 88 : index
    %88 = memref.load %arg3[%c88] : memref<132xf32, #tpu.memory_space<smem>>
    %c89 = arith.constant 89 : index
    %89 = memref.load %arg3[%c89] : memref<132xf32, #tpu.memory_space<smem>>
    %c90 = arith.constant 90 : index
    %90 = memref.load %arg3[%c90] : memref<132xf32, #tpu.memory_space<smem>>
    %c91 = arith.constant 91 : index
    %91 = memref.load %arg3[%c91] : memref<132xf32, #tpu.memory_space<smem>>
    %c92 = arith.constant 92 : index
    %92 = memref.load %arg3[%c92] : memref<132xf32, #tpu.memory_space<smem>>
    %c93 = arith.constant 93 : index
    %93 = memref.load %arg3[%c93] : memref<132xf32, #tpu.memory_space<smem>>
    %c94 = arith.constant 94 : index
    %94 = memref.load %arg3[%c94] : memref<132xf32, #tpu.memory_space<smem>>
    %c95 = arith.constant 95 : index
    %95 = memref.load %arg3[%c95] : memref<132xf32, #tpu.memory_space<smem>>
    %c96 = arith.constant 96 : index
    %96 = memref.load %arg3[%c96] : memref<132xf32, #tpu.memory_space<smem>>
    %c97 = arith.constant 97 : index
    %97 = memref.load %arg3[%c97] : memref<132xf32, #tpu.memory_space<smem>>
    %c98 = arith.constant 98 : index
    %98 = memref.load %arg3[%c98] : memref<132xf32, #tpu.memory_space<smem>>
    %c99 = arith.constant 99 : index
    %99 = memref.load %arg3[%c99] : memref<132xf32, #tpu.memory_space<smem>>
    %c100 = arith.constant 100 : index
    %100 = memref.load %arg3[%c100] : memref<132xf32, #tpu.memory_space<smem>>
    %c101 = arith.constant 101 : index
    %101 = memref.load %arg3[%c101] : memref<132xf32, #tpu.memory_space<smem>>
    %c102 = arith.constant 102 : index
    %102 = memref.load %arg3[%c102] : memref<132xf32, #tpu.memory_space<smem>>
    %c103 = arith.constant 103 : index
    %103 = memref.load %arg3[%c103] : memref<132xf32, #tpu.memory_space<smem>>
    %c104 = arith.constant 104 : index
    %104 = memref.load %arg3[%c104] : memref<132xf32, #tpu.memory_space<smem>>
    %c105 = arith.constant 105 : index
    %105 = memref.load %arg3[%c105] : memref<132xf32, #tpu.memory_space<smem>>
    %c106 = arith.constant 106 : index
    %106 = memref.load %arg3[%c106] : memref<132xf32, #tpu.memory_space<smem>>
    %c107 = arith.constant 107 : index
    %107 = memref.load %arg3[%c107] : memref<132xf32, #tpu.memory_space<smem>>
    %c108 = arith.constant 108 : index
    %108 = memref.load %arg3[%c108] : memref<132xf32, #tpu.memory_space<smem>>
    %c109 = arith.constant 109 : index
    %109 = memref.load %arg3[%c109] : memref<132xf32, #tpu.memory_space<smem>>
    %c110 = arith.constant 110 : index
    %110 = memref.load %arg3[%c110] : memref<132xf32, #tpu.memory_space<smem>>
    %c111 = arith.constant 111 : index
    %111 = memref.load %arg3[%c111] : memref<132xf32, #tpu.memory_space<smem>>
    %c112 = arith.constant 112 : index
    %112 = memref.load %arg3[%c112] : memref<132xf32, #tpu.memory_space<smem>>
    %c113 = arith.constant 113 : index
    %113 = memref.load %arg3[%c113] : memref<132xf32, #tpu.memory_space<smem>>
    %c114 = arith.constant 114 : index
    %114 = memref.load %arg3[%c114] : memref<132xf32, #tpu.memory_space<smem>>
    %c115 = arith.constant 115 : index
    %115 = memref.load %arg3[%c115] : memref<132xf32, #tpu.memory_space<smem>>
    %c116 = arith.constant 116 : index
    %116 = memref.load %arg3[%c116] : memref<132xf32, #tpu.memory_space<smem>>
    %c117 = arith.constant 117 : index
    %117 = memref.load %arg3[%c117] : memref<132xf32, #tpu.memory_space<smem>>
    %c118 = arith.constant 118 : index
    %118 = memref.load %arg3[%c118] : memref<132xf32, #tpu.memory_space<smem>>
    %c119 = arith.constant 119 : index
    %119 = memref.load %arg3[%c119] : memref<132xf32, #tpu.memory_space<smem>>
    %c120 = arith.constant 120 : index
    %120 = memref.load %arg3[%c120] : memref<132xf32, #tpu.memory_space<smem>>
    %c121 = arith.constant 121 : index
    %121 = memref.load %arg3[%c121] : memref<132xf32, #tpu.memory_space<smem>>
    %c122 = arith.constant 122 : index
    %122 = memref.load %arg3[%c122] : memref<132xf32, #tpu.memory_space<smem>>
    %c123 = arith.constant 123 : index
    %123 = memref.load %arg3[%c123] : memref<132xf32, #tpu.memory_space<smem>>
    %c124 = arith.constant 124 : index
    %124 = memref.load %arg3[%c124] : memref<132xf32, #tpu.memory_space<smem>>
    %c125 = arith.constant 125 : index
    %125 = memref.load %arg3[%c125] : memref<132xf32, #tpu.memory_space<smem>>
    %c126 = arith.constant 126 : index
    %126 = memref.load %arg3[%c126] : memref<132xf32, #tpu.memory_space<smem>>
    %c127 = arith.constant 127 : index
    %127 = memref.load %arg3[%c127] : memref<132xf32, #tpu.memory_space<smem>>
    %c128 = arith.constant 128 : index
    %128 = memref.load %arg3[%c128] : memref<132xf32, #tpu.memory_space<smem>>
    %c129 = arith.constant 129 : index
    %129 = memref.load %arg3[%c129] : memref<132xf32, #tpu.memory_space<smem>>
    %c130 = arith.constant 130 : index
    %130 = memref.load %arg3[%c130] : memref<132xf32, #tpu.memory_space<smem>>
    %c131 = arith.constant 131 : index
    %131 = memref.load %arg3[%c131] : memref<132xf32, #tpu.memory_space<smem>>
    %c0_0 = arith.constant 0 : index
    %132 = memref.load %arg4[%c0_0] : memref<17xf32, #tpu.memory_space<smem>>
    %c1_1 = arith.constant 1 : index
    %133 = memref.load %arg4[%c1_1] : memref<17xf32, #tpu.memory_space<smem>>
    %c2_2 = arith.constant 2 : index
    %134 = memref.load %arg4[%c2_2] : memref<17xf32, #tpu.memory_space<smem>>
    %c3_3 = arith.constant 3 : index
    %135 = memref.load %arg4[%c3_3] : memref<17xf32, #tpu.memory_space<smem>>
    %c4_4 = arith.constant 4 : index
    %136 = memref.load %arg4[%c4_4] : memref<17xf32, #tpu.memory_space<smem>>
    %c5_5 = arith.constant 5 : index
    %137 = memref.load %arg4[%c5_5] : memref<17xf32, #tpu.memory_space<smem>>
    %c6_6 = arith.constant 6 : index
    %138 = memref.load %arg4[%c6_6] : memref<17xf32, #tpu.memory_space<smem>>
    %c7_7 = arith.constant 7 : index
    %139 = memref.load %arg4[%c7_7] : memref<17xf32, #tpu.memory_space<smem>>
    %c8_8 = arith.constant 8 : index
    %140 = memref.load %arg4[%c8_8] : memref<17xf32, #tpu.memory_space<smem>>
    %c9_9 = arith.constant 9 : index
    %141 = memref.load %arg4[%c9_9] : memref<17xf32, #tpu.memory_space<smem>>
    %c10_10 = arith.constant 10 : index
    %142 = memref.load %arg4[%c10_10] : memref<17xf32, #tpu.memory_space<smem>>
    %c11_11 = arith.constant 11 : index
    %143 = memref.load %arg4[%c11_11] : memref<17xf32, #tpu.memory_space<smem>>
    %c12_12 = arith.constant 12 : index
    %144 = memref.load %arg4[%c12_12] : memref<17xf32, #tpu.memory_space<smem>>
    %c13_13 = arith.constant 13 : index
    %145 = memref.load %arg4[%c13_13] : memref<17xf32, #tpu.memory_space<smem>>
    %c14_14 = arith.constant 14 : index
    %146 = memref.load %arg4[%c14_14] : memref<17xf32, #tpu.memory_space<smem>>
    %c15_15 = arith.constant 15 : index
    %147 = memref.load %arg4[%c15_15] : memref<17xf32, #tpu.memory_space<smem>>
    %c16_16 = arith.constant 16 : index
    %148 = memref.load %arg4[%c16_16] : memref<17xf32, #tpu.memory_space<smem>>
    %c0_i32 = arith.constant 0 : i32
    %c2_i32 = arith.constant 2 : i32
    %149 = arith.muli %c0_i32, %c2_i32 : i32
    %c0_17 = arith.constant 0 : index
    %c0_18 = arith.constant 0 : index
    %150 = arith.index_cast %149 : i32 to index
    %c0_19 = arith.constant 0 : index
    %151 = vector.load %arg2[%c0_17, %c0_18, %150, %c0_19] : memref<1x4x2x128xf32, #tpu.memory_space<vmem>>, vector<1x1x2x128xf32>
    %152 = vector.shape_cast %151 : vector<1x1x2x128xf32> to vector<2x128xf32>
    %c0_20 = arith.constant 0 : index
    %c1_21 = arith.constant 1 : index
    %153 = arith.index_cast %149 : i32 to index
    %c0_22 = arith.constant 0 : index
    %154 = vector.load %arg2[%c0_20, %c1_21, %153, %c0_22] : memref<1x4x2x128xf32, #tpu.memory_space<vmem>>, vector<1x1x2x128xf32>
    %155 = vector.shape_cast %154 : vector<1x1x2x128xf32> to vector<2x128xf32>
    %c0_23 = arith.constant 0 : index
    %c2_24 = arith.constant 2 : index
    %156 = arith.index_cast %149 : i32 to index
    %c0_25 = arith.constant 0 : index
    %157 = vector.load %arg2[%c0_23, %c2_24, %156, %c0_25] : memref<1x4x2x128xf32, #tpu.memory_space<vmem>>, vector<1x1x2x128xf32>
    %158 = vector.shape_cast %157 : vector<1x1x2x128xf32> to vector<2x128xf32>
    %c0_26 = arith.constant 0 : index
    %c3_27 = arith.constant 3 : index
    %159 = arith.index_cast %149 : i32 to index
    %c0_28 = arith.constant 0 : index
    %160 = vector.load %arg2[%c0_26, %c3_27, %159, %c0_28] : memref<1x4x2x128xf32, #tpu.memory_space<vmem>>, vector<1x1x2x128xf32>
    %161 = vector.shape_cast %160 : vector<1x1x2x128xf32> to vector<2x128xf32>
    %162 = vector.broadcast %0 : f32 to vector<2x128xf32>
    %163 = arith.mulf %152, %162 : vector<2x128xf32>
    %164 = vector.broadcast %132 : f32 to vector<2x128xf32>
    %165 = arith.addf %163, %164 : vector<2x128xf32>
    %166 = vector.broadcast %1 : f32 to vector<2x128xf32>
    %167 = arith.mulf %155, %166 : vector<2x128xf32>
    %168 = vector.broadcast %4 : f32 to vector<2x128xf32>
    %169 = arith.mulf %152, %168 : vector<2x128xf32>
    %170 = vector.broadcast %133 : f32 to vector<2x128xf32>
    %171 = arith.addf %169, %170 : vector<2x128xf32>
    %172 = vector.broadcast %5 : f32 to vector<2x128xf32>
    %173 = arith.mulf %155, %172 : vector<2x128xf32>
    %174 = vector.broadcast %2 : f32 to vector<2x128xf32>
    %175 = arith.mulf %158, %174 : vector<2x128xf32>
    %176 = arith.addf %165, %175 : vector<2x128xf32>
    %177 = vector.broadcast %6 : f32 to vector<2x128xf32>
    %178 = arith.mulf %158, %177 : vector<2x128xf32>
    %179 = arith.addf %171, %178 : vector<2x128xf32>
    %180 = vector.broadcast %3 : f32 to vector<2x128xf32>
    %181 = arith.mulf %161, %180 : vector<2x128xf32>
    %182 = arith.addf %167, %181 : vector<2x128xf32>
    %183 = vector.broadcast %7 : f32 to vector<2x128xf32>
    %184 = arith.mulf %161, %183 : vector<2x128xf32>
    %185 = arith.addf %173, %184 : vector<2x128xf32>
    %186 = arith.addf %176, %182 : vector<2x128xf32>
    %187 = arith.addf %179, %185 : vector<2x128xf32>
    %188 = arith.mulf %186, %187 : vector<2x128xf32>
    %189 = vector.broadcast %8 : f32 to vector<2x128xf32>
    %190 = arith.mulf %152, %189 : vector<2x128xf32>
    %191 = vector.broadcast %134 : f32 to vector<2x128xf32>
    %192 = arith.addf %190, %191 : vector<2x128xf32>
    %193 = vector.broadcast %9 : f32 to vector<2x128xf32>
    %194 = arith.mulf %155, %193 : vector<2x128xf32>
    %195 = vector.broadcast %13 : f32 to vector<2x128xf32>
    %196 = arith.mulf %152, %195 : vector<2x128xf32>
    %197 = vector.broadcast %135 : f32 to vector<2x128xf32>
    %198 = arith.addf %196, %197 : vector<2x128xf32>
    %199 = vector.broadcast %14 : f32 to vector<2x128xf32>
    %200 = arith.mulf %155, %199 : vector<2x128xf32>
    %201 = vector.broadcast %10 : f32 to vector<2x128xf32>
    %202 = arith.mulf %158, %201 : vector<2x128xf32>
    %203 = arith.addf %192, %202 : vector<2x128xf32>
    %204 = vector.broadcast %15 : f32 to vector<2x128xf32>
    %205 = arith.mulf %158, %204 : vector<2x128xf32>
    %206 = arith.addf %198, %205 : vector<2x128xf32>
    %207 = vector.broadcast %11 : f32 to vector<2x128xf32>
    %208 = arith.mulf %161, %207 : vector<2x128xf32>
    %209 = arith.addf %194, %208 : vector<2x128xf32>
    %210 = vector.broadcast %16 : f32 to vector<2x128xf32>
    %211 = arith.mulf %161, %210 : vector<2x128xf32>
    %212 = arith.addf %200, %211 : vector<2x128xf32>
    %213 = vector.broadcast %12 : f32 to vector<2x128xf32>
    %214 = arith.mulf %188, %213 : vector<2x128xf32>
    %215 = arith.addf %203, %214 : vector<2x128xf32>
    %216 = vector.broadcast %17 : f32 to vector<2x128xf32>
    %217 = arith.mulf %188, %216 : vector<2x128xf32>
    %218 = arith.addf %206, %217 : vector<2x128xf32>
    %219 = arith.addf %215, %209 : vector<2x128xf32>
    %220 = arith.addf %218, %212 : vector<2x128xf32>
    %221 = arith.mulf %219, %220 : vector<2x128xf32>
    %222 = vector.broadcast %18 : f32 to vector<2x128xf32>
    %223 = arith.mulf %152, %222 : vector<2x128xf32>
    %224 = vector.broadcast %136 : f32 to vector<2x128xf32>
    %225 = arith.addf %223, %224 : vector<2x128xf32>
    %226 = vector.broadcast %19 : f32 to vector<2x128xf32>
    %227 = arith.mulf %155, %226 : vector<2x128xf32>
    %228 = vector.broadcast %24 : f32 to vector<2x128xf32>
    %229 = arith.mulf %152, %228 : vector<2x128xf32>
    %230 = vector.broadcast %137 : f32 to vector<2x128xf32>
    %231 = arith.addf %229, %230 : vector<2x128xf32>
    %232 = vector.broadcast %25 : f32 to vector<2x128xf32>
    %233 = arith.mulf %155, %232 : vector<2x128xf32>
    %234 = vector.broadcast %20 : f32 to vector<2x128xf32>
    %235 = arith.mulf %158, %234 : vector<2x128xf32>
    %236 = arith.addf %225, %235 : vector<2x128xf32>
    %237 = vector.broadcast %26 : f32 to vector<2x128xf32>
    %238 = arith.mulf %158, %237 : vector<2x128xf32>
    %239 = arith.addf %231, %238 : vector<2x128xf32>
    %240 = vector.broadcast %21 : f32 to vector<2x128xf32>
    %241 = arith.mulf %161, %240 : vector<2x128xf32>
    %242 = arith.addf %227, %241 : vector<2x128xf32>
    %243 = vector.broadcast %27 : f32 to vector<2x128xf32>
    %244 = arith.mulf %161, %243 : vector<2x128xf32>
    %245 = arith.addf %233, %244 : vector<2x128xf32>
    %246 = vector.broadcast %22 : f32 to vector<2x128xf32>
    %247 = arith.mulf %188, %246 : vector<2x128xf32>
    %248 = arith.addf %236, %247 : vector<2x128xf32>
    %249 = vector.broadcast %28 : f32 to vector<2x128xf32>
    %250 = arith.mulf %188, %249 : vector<2x128xf32>
    %251 = arith.addf %239, %250 : vector<2x128xf32>
    %252 = vector.broadcast %23 : f32 to vector<2x128xf32>
    %253 = arith.mulf %221, %252 : vector<2x128xf32>
    %254 = arith.addf %242, %253 : vector<2x128xf32>
    %255 = vector.broadcast %29 : f32 to vector<2x128xf32>
    %256 = arith.mulf %221, %255 : vector<2x128xf32>
    %257 = arith.addf %245, %256 : vector<2x128xf32>
    %258 = arith.addf %248, %254 : vector<2x128xf32>
    %259 = arith.addf %251, %257 : vector<2x128xf32>
    %260 = tpu.reciprocal %259 {approx = true} : vector<2x128xf32> -> vector<2x128xf32>
    %261 = arith.mulf %259, %260 : vector<2x128xf32>
    %cst = arith.constant 2.000000e+00 : f32
    %262 = vector.broadcast %cst : f32 to vector<2x128xf32>
    %263 = arith.subf %262, %261 : vector<2x128xf32>
    %264 = arith.mulf %260, %263 : vector<2x128xf32>
    %265 = arith.mulf %258, %264 : vector<2x128xf32>
    %266 = vector.broadcast %30 : f32 to vector<2x128xf32>
    %267 = arith.mulf %152, %266 : vector<2x128xf32>
    %268 = vector.broadcast %138 : f32 to vector<2x128xf32>
    %269 = arith.addf %267, %268 : vector<2x128xf32>
    %270 = vector.broadcast %31 : f32 to vector<2x128xf32>
    %271 = arith.mulf %155, %270 : vector<2x128xf32>
    %272 = vector.broadcast %37 : f32 to vector<2x128xf32>
    %273 = arith.mulf %152, %272 : vector<2x128xf32>
    %274 = vector.broadcast %139 : f32 to vector<2x128xf32>
    %275 = arith.addf %273, %274 : vector<2x128xf32>
    %276 = vector.broadcast %38 : f32 to vector<2x128xf32>
    %277 = arith.mulf %155, %276 : vector<2x128xf32>
    %278 = vector.broadcast %32 : f32 to vector<2x128xf32>
    %279 = arith.mulf %158, %278 : vector<2x128xf32>
    %280 = arith.addf %269, %279 : vector<2x128xf32>
    %281 = vector.broadcast %39 : f32 to vector<2x128xf32>
    %282 = arith.mulf %158, %281 : vector<2x128xf32>
    %283 = arith.addf %275, %282 : vector<2x128xf32>
    %284 = vector.broadcast %33 : f32 to vector<2x128xf32>
    %285 = arith.mulf %161, %284 : vector<2x128xf32>
    %286 = arith.addf %271, %285 : vector<2x128xf32>
    %287 = vector.broadcast %40 : f32 to vector<2x128xf32>
    %288 = arith.mulf %161, %287 : vector<2x128xf32>
    %289 = arith.addf %277, %288 : vector<2x128xf32>
    %290 = vector.broadcast %34 : f32 to vector<2x128xf32>
    %291 = arith.mulf %188, %290 : vector<2x128xf32>
    %292 = arith.addf %280, %291 : vector<2x128xf32>
    %293 = vector.broadcast %41 : f32 to vector<2x128xf32>
    %294 = arith.mulf %188, %293 : vector<2x128xf32>
    %295 = arith.addf %283, %294 : vector<2x128xf32>
    %296 = vector.broadcast %35 : f32 to vector<2x128xf32>
    %297 = arith.mulf %221, %296 : vector<2x128xf32>
    %298 = arith.addf %286, %297 : vector<2x128xf32>
    %299 = vector.broadcast %42 : f32 to vector<2x128xf32>
    %300 = arith.mulf %221, %299 : vector<2x128xf32>
    %301 = arith.addf %289, %300 : vector<2x128xf32>
    %302 = vector.broadcast %36 : f32 to vector<2x128xf32>
    %303 = arith.mulf %265, %302 : vector<2x128xf32>
    %304 = arith.addf %292, %303 : vector<2x128xf32>
    %305 = vector.broadcast %43 : f32 to vector<2x128xf32>
    %306 = arith.mulf %265, %305 : vector<2x128xf32>
    %307 = arith.addf %295, %306 : vector<2x128xf32>
    %308 = arith.addf %304, %298 : vector<2x128xf32>
    %309 = arith.addf %307, %301 : vector<2x128xf32>
    %310 = tpu.reciprocal %309 {approx = true} : vector<2x128xf32> -> vector<2x128xf32>
    %311 = arith.mulf %309, %310 : vector<2x128xf32>
    %cst_29 = arith.constant 2.000000e+00 : f32
    %312 = vector.broadcast %cst_29 : f32 to vector<2x128xf32>
    %313 = arith.subf %312, %311 : vector<2x128xf32>
    %314 = arith.mulf %310, %313 : vector<2x128xf32>
    %315 = arith.mulf %308, %314 : vector<2x128xf32>
    %316 = vector.broadcast %44 : f32 to vector<2x128xf32>
    %317 = arith.mulf %152, %316 : vector<2x128xf32>
    %318 = vector.broadcast %140 : f32 to vector<2x128xf32>
    %319 = arith.addf %317, %318 : vector<2x128xf32>
    %320 = vector.broadcast %45 : f32 to vector<2x128xf32>
    %321 = arith.mulf %155, %320 : vector<2x128xf32>
    %322 = vector.broadcast %52 : f32 to vector<2x128xf32>
    %323 = arith.mulf %152, %322 : vector<2x128xf32>
    %324 = vector.broadcast %141 : f32 to vector<2x128xf32>
    %325 = arith.addf %323, %324 : vector<2x128xf32>
    %326 = vector.broadcast %53 : f32 to vector<2x128xf32>
    %327 = arith.mulf %155, %326 : vector<2x128xf32>
    %328 = vector.broadcast %46 : f32 to vector<2x128xf32>
    %329 = arith.mulf %158, %328 : vector<2x128xf32>
    %330 = arith.addf %319, %329 : vector<2x128xf32>
    %331 = vector.broadcast %54 : f32 to vector<2x128xf32>
    %332 = arith.mulf %158, %331 : vector<2x128xf32>
    %333 = arith.addf %325, %332 : vector<2x128xf32>
    %334 = vector.broadcast %47 : f32 to vector<2x128xf32>
    %335 = arith.mulf %161, %334 : vector<2x128xf32>
    %336 = arith.addf %321, %335 : vector<2x128xf32>
    %337 = vector.broadcast %55 : f32 to vector<2x128xf32>
    %338 = arith.mulf %161, %337 : vector<2x128xf32>
    %339 = arith.addf %327, %338 : vector<2x128xf32>
    %340 = vector.broadcast %48 : f32 to vector<2x128xf32>
    %341 = arith.mulf %188, %340 : vector<2x128xf32>
    %342 = arith.addf %330, %341 : vector<2x128xf32>
    %343 = vector.broadcast %56 : f32 to vector<2x128xf32>
    %344 = arith.mulf %188, %343 : vector<2x128xf32>
    %345 = arith.addf %333, %344 : vector<2x128xf32>
    %346 = vector.broadcast %49 : f32 to vector<2x128xf32>
    %347 = arith.mulf %221, %346 : vector<2x128xf32>
    %348 = arith.addf %336, %347 : vector<2x128xf32>
    %349 = vector.broadcast %57 : f32 to vector<2x128xf32>
    %350 = arith.mulf %221, %349 : vector<2x128xf32>
    %351 = arith.addf %339, %350 : vector<2x128xf32>
    %352 = vector.broadcast %50 : f32 to vector<2x128xf32>
    %353 = arith.mulf %265, %352 : vector<2x128xf32>
    %354 = arith.addf %342, %353 : vector<2x128xf32>
    %355 = vector.broadcast %58 : f32 to vector<2x128xf32>
    %356 = arith.mulf %265, %355 : vector<2x128xf32>
    %357 = arith.addf %345, %356 : vector<2x128xf32>
    %358 = vector.broadcast %51 : f32 to vector<2x128xf32>
    %359 = arith.mulf %315, %358 : vector<2x128xf32>
    %360 = arith.addf %348, %359 : vector<2x128xf32>
    %361 = vector.broadcast %59 : f32 to vector<2x128xf32>
    %362 = arith.mulf %315, %361 : vector<2x128xf32>
    %363 = arith.addf %351, %362 : vector<2x128xf32>
    %364 = arith.addf %354, %360 : vector<2x128xf32>
    %365 = arith.addf %357, %363 : vector<2x128xf32>
    %366 = arith.mulf %364, %365 : vector<2x128xf32>
    %367 = vector.broadcast %60 : f32 to vector<2x128xf32>
    %368 = arith.mulf %152, %367 : vector<2x128xf32>
    %369 = vector.broadcast %142 : f32 to vector<2x128xf32>
    %370 = arith.addf %368, %369 : vector<2x128xf32>
    %371 = vector.broadcast %61 : f32 to vector<2x128xf32>
    %372 = arith.mulf %155, %371 : vector<2x128xf32>
    %373 = vector.broadcast %69 : f32 to vector<2x128xf32>
    %374 = arith.mulf %152, %373 : vector<2x128xf32>
    %375 = vector.broadcast %143 : f32 to vector<2x128xf32>
    %376 = arith.addf %374, %375 : vector<2x128xf32>
    %377 = vector.broadcast %70 : f32 to vector<2x128xf32>
    %378 = arith.mulf %155, %377 : vector<2x128xf32>
    %379 = vector.broadcast %62 : f32 to vector<2x128xf32>
    %380 = arith.mulf %158, %379 : vector<2x128xf32>
    %381 = arith.addf %370, %380 : vector<2x128xf32>
    %382 = vector.broadcast %71 : f32 to vector<2x128xf32>
    %383 = arith.mulf %158, %382 : vector<2x128xf32>
    %384 = arith.addf %376, %383 : vector<2x128xf32>
    %385 = vector.broadcast %63 : f32 to vector<2x128xf32>
    %386 = arith.mulf %161, %385 : vector<2x128xf32>
    %387 = arith.addf %372, %386 : vector<2x128xf32>
    %388 = vector.broadcast %72 : f32 to vector<2x128xf32>
    %389 = arith.mulf %161, %388 : vector<2x128xf32>
    %390 = arith.addf %378, %389 : vector<2x128xf32>
    %391 = vector.broadcast %64 : f32 to vector<2x128xf32>
    %392 = arith.mulf %188, %391 : vector<2x128xf32>
    %393 = arith.addf %381, %392 : vector<2x128xf32>
    %394 = vector.broadcast %73 : f32 to vector<2x128xf32>
    %395 = arith.mulf %188, %394 : vector<2x128xf32>
    %396 = arith.addf %384, %395 : vector<2x128xf32>
    %397 = vector.broadcast %65 : f32 to vector<2x128xf32>
    %398 = arith.mulf %221, %397 : vector<2x128xf32>
    %399 = arith.addf %387, %398 : vector<2x128xf32>
    %400 = vector.broadcast %74 : f32 to vector<2x128xf32>
    %401 = arith.mulf %221, %400 : vector<2x128xf32>
    %402 = arith.addf %390, %401 : vector<2x128xf32>
    %403 = vector.broadcast %66 : f32 to vector<2x128xf32>
    %404 = arith.mulf %265, %403 : vector<2x128xf32>
    %405 = arith.addf %393, %404 : vector<2x128xf32>
    %406 = vector.broadcast %75 : f32 to vector<2x128xf32>
    %407 = arith.mulf %265, %406 : vector<2x128xf32>
    %408 = arith.addf %396, %407 : vector<2x128xf32>
    %409 = vector.broadcast %67 : f32 to vector<2x128xf32>
    %410 = arith.mulf %315, %409 : vector<2x128xf32>
    %411 = arith.addf %399, %410 : vector<2x128xf32>
    %412 = vector.broadcast %76 : f32 to vector<2x128xf32>
    %413 = arith.mulf %315, %412 : vector<2x128xf32>
    %414 = arith.addf %402, %413 : vector<2x128xf32>
    %415 = vector.broadcast %68 : f32 to vector<2x128xf32>
    %416 = arith.mulf %366, %415 : vector<2x128xf32>
    %417 = arith.addf %405, %416 : vector<2x128xf32>
    %418 = vector.broadcast %77 : f32 to vector<2x128xf32>
    %419 = arith.mulf %366, %418 : vector<2x128xf32>
    %420 = arith.addf %408, %419 : vector<2x128xf32>
    %421 = arith.addf %417, %411 : vector<2x128xf32>
    %422 = arith.addf %420, %414 : vector<2x128xf32>
    %423 = arith.mulf %421, %422 : vector<2x128xf32>
    %424 = vector.broadcast %78 : f32 to vector<2x128xf32>
    %425 = arith.mulf %152, %424 : vector<2x128xf32>
    %426 = vector.broadcast %144 : f32 to vector<2x128xf32>
    %427 = arith.addf %425, %426 : vector<2x128xf32>
    %428 = vector.broadcast %79 : f32 to vector<2x128xf32>
    %429 = arith.mulf %155, %428 : vector<2x128xf32>
    %430 = vector.broadcast %88 : f32 to vector<2x128xf32>
    %431 = arith.mulf %152, %430 : vector<2x128xf32>
    %432 = vector.broadcast %145 : f32 to vector<2x128xf32>
    %433 = arith.addf %431, %432 : vector<2x128xf32>
    %434 = vector.broadcast %89 : f32 to vector<2x128xf32>
    %435 = arith.mulf %155, %434 : vector<2x128xf32>
    %436 = vector.broadcast %80 : f32 to vector<2x128xf32>
    %437 = arith.mulf %158, %436 : vector<2x128xf32>
    %438 = arith.addf %427, %437 : vector<2x128xf32>
    %439 = vector.broadcast %90 : f32 to vector<2x128xf32>
    %440 = arith.mulf %158, %439 : vector<2x128xf32>
    %441 = arith.addf %433, %440 : vector<2x128xf32>
    %442 = vector.broadcast %81 : f32 to vector<2x128xf32>
    %443 = arith.mulf %161, %442 : vector<2x128xf32>
    %444 = arith.addf %429, %443 : vector<2x128xf32>
    %445 = vector.broadcast %91 : f32 to vector<2x128xf32>
    %446 = arith.mulf %161, %445 : vector<2x128xf32>
    %447 = arith.addf %435, %446 : vector<2x128xf32>
    %448 = vector.broadcast %82 : f32 to vector<2x128xf32>
    %449 = arith.mulf %188, %448 : vector<2x128xf32>
    %450 = arith.addf %438, %449 : vector<2x128xf32>
    %451 = vector.broadcast %92 : f32 to vector<2x128xf32>
    %452 = arith.mulf %188, %451 : vector<2x128xf32>
    %453 = arith.addf %441, %452 : vector<2x128xf32>
    %454 = vector.broadcast %83 : f32 to vector<2x128xf32>
    %455 = arith.mulf %221, %454 : vector<2x128xf32>
    %456 = arith.addf %444, %455 : vector<2x128xf32>
    %457 = vector.broadcast %93 : f32 to vector<2x128xf32>
    %458 = arith.mulf %221, %457 : vector<2x128xf32>
    %459 = arith.addf %447, %458 : vector<2x128xf32>
    %460 = vector.broadcast %84 : f32 to vector<2x128xf32>
    %461 = arith.mulf %265, %460 : vector<2x128xf32>
    %462 = arith.addf %450, %461 : vector<2x128xf32>
    %463 = vector.broadcast %94 : f32 to vector<2x128xf32>
    %464 = arith.mulf %265, %463 : vector<2x128xf32>
    %465 = arith.addf %453, %464 : vector<2x128xf32>
    %466 = vector.broadcast %85 : f32 to vector<2x128xf32>
    %467 = arith.mulf %315, %466 : vector<2x128xf32>
    %468 = arith.addf %456, %467 : vector<2x128xf32>
    %469 = vector.broadcast %95 : f32 to vector<2x128xf32>
    %470 = arith.mulf %315, %469 : vector<2x128xf32>
    %471 = arith.addf %459, %470 : vector<2x128xf32>
    %472 = vector.broadcast %86 : f32 to vector<2x128xf32>
    %473 = arith.mulf %366, %472 : vector<2x128xf32>
    %474 = arith.addf %462, %473 : vector<2x128xf32>
    %475 = vector.broadcast %96 : f32 to vector<2x128xf32>
    %476 = arith.mulf %366, %475 : vector<2x128xf32>
    %477 = arith.addf %465, %476 : vector<2x128xf32>
    %478 = vector.broadcast %87 : f32 to vector<2x128xf32>
    %479 = arith.mulf %423, %478 : vector<2x128xf32>
    %480 = arith.addf %468, %479 : vector<2x128xf32>
    %481 = vector.broadcast %97 : f32 to vector<2x128xf32>
    %482 = arith.mulf %423, %481 : vector<2x128xf32>
    %483 = arith.addf %471, %482 : vector<2x128xf32>
    %484 = arith.addf %474, %480 : vector<2x128xf32>
    %485 = arith.addf %477, %483 : vector<2x128xf32>
    %486 = arith.mulf %484, %485 : vector<2x128xf32>
    %487 = vector.broadcast %98 : f32 to vector<2x128xf32>
    %488 = arith.mulf %152, %487 : vector<2x128xf32>
    %489 = vector.broadcast %146 : f32 to vector<2x128xf32>
    %490 = arith.addf %488, %489 : vector<2x128xf32>
    %491 = vector.broadcast %99 : f32 to vector<2x128xf32>
    %492 = arith.mulf %155, %491 : vector<2x128xf32>
    %493 = vector.broadcast %109 : f32 to vector<2x128xf32>
    %494 = arith.mulf %152, %493 : vector<2x128xf32>
    %495 = vector.broadcast %147 : f32 to vector<2x128xf32>
    %496 = arith.addf %494, %495 : vector<2x128xf32>
    %497 = vector.broadcast %110 : f32 to vector<2x128xf32>
    %498 = arith.mulf %155, %497 : vector<2x128xf32>
    %499 = vector.broadcast %100 : f32 to vector<2x128xf32>
    %500 = arith.mulf %158, %499 : vector<2x128xf32>
    %501 = arith.addf %490, %500 : vector<2x128xf32>
    %502 = vector.broadcast %111 : f32 to vector<2x128xf32>
    %503 = arith.mulf %158, %502 : vector<2x128xf32>
    %504 = arith.addf %496, %503 : vector<2x128xf32>
    %505 = vector.broadcast %101 : f32 to vector<2x128xf32>
    %506 = arith.mulf %161, %505 : vector<2x128xf32>
    %507 = arith.addf %492, %506 : vector<2x128xf32>
    %508 = vector.broadcast %112 : f32 to vector<2x128xf32>
    %509 = arith.mulf %161, %508 : vector<2x128xf32>
    %510 = arith.addf %498, %509 : vector<2x128xf32>
    %511 = vector.broadcast %102 : f32 to vector<2x128xf32>
    %512 = arith.mulf %188, %511 : vector<2x128xf32>
    %513 = arith.addf %501, %512 : vector<2x128xf32>
    %514 = vector.broadcast %113 : f32 to vector<2x128xf32>
    %515 = arith.mulf %188, %514 : vector<2x128xf32>
    %516 = arith.addf %504, %515 : vector<2x128xf32>
    %517 = vector.broadcast %103 : f32 to vector<2x128xf32>
    %518 = arith.mulf %221, %517 : vector<2x128xf32>
    %519 = arith.addf %507, %518 : vector<2x128xf32>
    %520 = vector.broadcast %114 : f32 to vector<2x128xf32>
    %521 = arith.mulf %221, %520 : vector<2x128xf32>
    %522 = arith.addf %510, %521 : vector<2x128xf32>
    %523 = vector.broadcast %104 : f32 to vector<2x128xf32>
    %524 = arith.mulf %265, %523 : vector<2x128xf32>
    %525 = arith.addf %513, %524 : vector<2x128xf32>
    %526 = vector.broadcast %115 : f32 to vector<2x128xf32>
    %527 = arith.mulf %265, %526 : vector<2x128xf32>
    %528 = arith.addf %516, %527 : vector<2x128xf32>
    %529 = vector.broadcast %105 : f32 to vector<2x128xf32>
    %530 = arith.mulf %315, %529 : vector<2x128xf32>
    %531 = arith.addf %519, %530 : vector<2x128xf32>
    %532 = vector.broadcast %116 : f32 to vector<2x128xf32>
    %533 = arith.mulf %315, %532 : vector<2x128xf32>
    %534 = arith.addf %522, %533 : vector<2x128xf32>
    %535 = vector.broadcast %106 : f32 to vector<2x128xf32>
    %536 = arith.mulf %366, %535 : vector<2x128xf32>
    %537 = arith.addf %525, %536 : vector<2x128xf32>
    %538 = vector.broadcast %117 : f32 to vector<2x128xf32>
    %539 = arith.mulf %366, %538 : vector<2x128xf32>
    %540 = arith.addf %528, %539 : vector<2x128xf32>
    %541 = vector.broadcast %107 : f32 to vector<2x128xf32>
    %542 = arith.mulf %423, %541 : vector<2x128xf32>
    %543 = arith.addf %531, %542 : vector<2x128xf32>
    %544 = vector.broadcast %118 : f32 to vector<2x128xf32>
    %545 = arith.mulf %423, %544 : vector<2x128xf32>
    %546 = arith.addf %534, %545 : vector<2x128xf32>
    %547 = vector.broadcast %108 : f32 to vector<2x128xf32>
    %548 = arith.mulf %486, %547 : vector<2x128xf32>
    %549 = arith.addf %537, %548 : vector<2x128xf32>
    %550 = vector.broadcast %119 : f32 to vector<2x128xf32>
    %551 = arith.mulf %486, %550 : vector<2x128xf32>
    %552 = arith.addf %540, %551 : vector<2x128xf32>
    %553 = arith.addf %549, %543 : vector<2x128xf32>
    %554 = arith.addf %552, %546 : vector<2x128xf32>
    %555 = arith.mulf %553, %554 : vector<2x128xf32>
    %556 = vector.broadcast %120 : f32 to vector<2x128xf32>
    %557 = arith.mulf %152, %556 : vector<2x128xf32>
    %558 = vector.broadcast %148 : f32 to vector<2x128xf32>
    %559 = arith.addf %557, %558 : vector<2x128xf32>
    %560 = vector.broadcast %121 : f32 to vector<2x128xf32>
    %561 = arith.mulf %155, %560 : vector<2x128xf32>
    %562 = vector.broadcast %122 : f32 to vector<2x128xf32>
    %563 = arith.mulf %158, %562 : vector<2x128xf32>
    %564 = arith.addf %559, %563 : vector<2x128xf32>
    %565 = vector.broadcast %123 : f32 to vector<2x128xf32>
    %566 = arith.mulf %161, %565 : vector<2x128xf32>
    %567 = arith.addf %561, %566 : vector<2x128xf32>
    %568 = vector.broadcast %124 : f32 to vector<2x128xf32>
    %569 = arith.mulf %188, %568 : vector<2x128xf32>
    %570 = arith.addf %564, %569 : vector<2x128xf32>
    %571 = vector.broadcast %125 : f32 to vector<2x128xf32>
    %572 = arith.mulf %221, %571 : vector<2x128xf32>
    %573 = arith.addf %567, %572 : vector<2x128xf32>
    %574 = vector.broadcast %126 : f32 to vector<2x128xf32>
    %575 = arith.mulf %265, %574 : vector<2x128xf32>
    %576 = arith.addf %570, %575 : vector<2x128xf32>
    %577 = vector.broadcast %127 : f32 to vector<2x128xf32>
    %578 = arith.mulf %315, %577 : vector<2x128xf32>
    %579 = arith.addf %573, %578 : vector<2x128xf32>
    %580 = vector.broadcast %128 : f32 to vector<2x128xf32>
    %581 = arith.mulf %366, %580 : vector<2x128xf32>
    %582 = arith.addf %576, %581 : vector<2x128xf32>
    %583 = vector.broadcast %129 : f32 to vector<2x128xf32>
    %584 = arith.mulf %423, %583 : vector<2x128xf32>
    %585 = arith.addf %579, %584 : vector<2x128xf32>
    %586 = vector.broadcast %130 : f32 to vector<2x128xf32>
    %587 = arith.mulf %486, %586 : vector<2x128xf32>
    %588 = arith.addf %582, %587 : vector<2x128xf32>
    %589 = vector.broadcast %131 : f32 to vector<2x128xf32>
    %590 = arith.mulf %555, %589 : vector<2x128xf32>
    %591 = arith.addf %585, %590 : vector<2x128xf32>
    %592 = arith.addf %588, %591 : vector<2x128xf32>
    %c0_30 = arith.constant 0 : index
    %593 = arith.index_cast %149 : i32 to index
    %c0_31 = arith.constant 0 : index
    %594 = vector.load %arg5[%c0_30, %593, %c0_31] : memref<1x2x128xf32, #tpu.memory_space<vmem>>, vector<1x2x128xf32>
    %595 = vector.shape_cast %594 : vector<1x2x128xf32> to vector<2x128xf32>
    %596 = vector.shape_cast %592 : vector<2x128xf32> to vector<1x2x128xf32>
    tpu.vector_store %arg5[%c0_30, %593, %c0_31], %596 {strides = array<i32>} : memref<1x2x128xf32, #tpu.memory_space<vmem>>, vector<1x2x128xf32>,
    %c1_i32 = arith.constant 1 : i32
    return
  }
  func.func @transform_0(%arg0: i32, %arg1: i32) -> (i32, i32, i32, i32) {
    %c0_i32 = arith.constant 0 : i32
    %c0_i32_0 = arith.constant 0 : i32
    %c0_i32_1 = arith.constant 0 : i32
    return %arg0, %c0_i32, %arg1, %c0_i32_0 : i32, i32, i32, i32
  }
  func.func @transform_1(%arg0: i32, %arg1: i32) -> i32 {
    %c0_i32 = arith.constant 0 : i32
    %c0_i32_0 = arith.constant 0 : i32
    return %c0_i32 : i32
  }
  func.func @transform_2(%arg0: i32, %arg1: i32) -> i32 {
    %c0_i32 = arith.constant 0 : i32
    %c0_i32_0 = arith.constant 0 : i32
    return %c0_i32 : i32
  }
  func.func @transform_3(%arg0: i32, %arg1: i32) -> (i32, i32, i32) {
    %c0_i32 = arith.constant 0 : i32
    %c0_i32_0 = arith.constant 0 : i32
    return %arg0, %arg1, %c0_i32 : i32, i32, i32
  }
}

</mosaic_0001>

<bundles_post_ra>
// kernel: tpu_custom_call.1
= control target key start
LH: loop header
LB: loop body
LE: loop exit
PB: predicated region body
PF: predicated region fallthrough
CT: control target
= control target key end

     0   :  { %s2279_s0 = inlined_call_operand.hbm [shape: f32[2,4,2,128], index: 0, kind: input, shape index: {}]   ;;  %s2280_s1 = inlined_call_operand.vmem [shape: f32[132], index: 1, kind: input, shape index: {}]   ;;  %s2281_s2 = inlined_call_operand.vmem [shape: f32[17], index: 2, kind: input, shape index: {}]   ;;  %s2282_s3 = inlined_call_operand.hbm [shape: f32[2,2,128], index: 3, kind: output, shape index: {}]  }
   0x1   :  { %2296 = sst [smem:[#allocation21_spill]] %s2279_s0 }
   0x2   :  { %2297 = sst [smem:[#allocation22_spill]] %s2280_s1 }
   0x3   :  { %2298 = sst [smem:[#allocation23_spill]] %s2281_s2 }
   0x4   :  { %8 = vsyncpa [#allocation3], 0 }
   0x5   :  { %10 = vsyncpa [#allocation3 + $0x1], 0 }
   0x6   :  { %11 = vsyncpa [#allocation5], 0 }
   0x7   :  { %12 = vsyncpa [#allocation8], 0 }
   0x8   :  { %13 = vsyncpa [#allocation4], 0 }
   0x9   :  { %15 = vsyncpa [#allocation4 + $0x1], 0  ;;  %s1373_s12 = smov 0   ;;  %s1375_s13 = smov 0  }
   0xa   :  { %s1377_s14 = smov 0   ;;  %s1379_s15 = smov 0  }
   0xb   :  { %s1381_s16 = smov 0   ;;  %s1383_s17 = smov 0  }
   0xc LB: > { %2299 = sst [smem:[#allocation14_spill]] %s1329_s13  ;;  %s937_s18 = sadd.s32 4294967295, %s1345_s17   ;;  %s1345_s17 = sphi %s1383_s17, %s21_s17   ;;  %s1341_s16 = sphi %s1381_s16, %s2330_s16   ;;  %s1337_s15 = sphi %s1379_s15, %s2329_s15   ;;  %s1333_s14 = sphi %s1377_s14, %s2328_s14   ;;  %s1329_s13 = sphi %s1375_s13, %s2327_s13   ;;  %s1325_s12 = sphi %s1373_s12, %s2326_s12  }
   0xd   : > { %2300 = sst [smem:[#allocation15_spill]] %s1333_s14  ;;  %s938_s19 = sadd.s32 4294967294, %s1345_s17  }
   0xe   : > { %2301 = sst [smem:[#allocation16_spill]] %s1341_s16  ;;  %s42_s20 = sadd.s32 1, %s1333_s14 }
   0xf   : > { %2302 = sst [smem:[#allocation17_spill]] %s1345_s17  ;;  %p49_p0 = scmp.ne.s32.totalorder %s1333_s14, %s1329_s13 }
  0x10   : > { %p50_p1 = scmp.eq.s32.totalorder %s1345_s17, 0  ;;  %p55_p2 = scmp.ne.s32.totalorder %s1329_s13, %s1325_s12 }
  0x11   : > { %p1411_p3 = scmp.eq.s32.totalorder %s937_s18, 0  ;;  %p123_p4 = scmp.eq.s32.totalorder %s937_s18, 1 }
  0x12   : > { %p1415_p5 = por %p50_p1, %p49_p0  ;;  %p129_p6 = scmp.eq.s32.totalorder %s938_s19, 1 }
  0x13   : > { %s2303_s21 = scalar_select %p1411_p3, 1, 0 }
  0x14   : > { %p1421_p7 = por %p1411_p3, %p55_p2  ;;  %p1425_p8 = por %p123_p4, %p49_p0 }
  0x15   : > { %p1429_p9 = por %p129_p6, %p55_p2  ;;  %p939_p10 = scmp.ge.s32.totalorder %s1345_s17, 1 }
  0x16   : > { %s2305_s23 = scalar_select %p1421_p7, 1, 0 }
  0x17   : > { %s2306_s24 = scalar_select %p1425_p8, 1, 0 }
  0x18   : > { %s2307_s25 = scalar_select %p1429_p9, 1, 0 }
  0x19   : > { %p136_p11 = scmp.lt.s32.totalorder %s1345_s17, 3  ;;  %s2309_s1 = sld [smem:[#allocation22_spill]] }
  0x1a   : > { %2308 = sst [smem:[#allocation18_spill]] %s2307_s25  ;;  %p1135_p0 = scmp.lt.s32.totalorder %s1345_s17, 2 }
  0x1b   : > { %p1438_p12 = pnand %p939_p10, %p136_p11  ;;  %s2311_s2 = sld [smem:[#allocation23_spill]] }
  0x1c   : > { %p1451_p2 = pnand %p1135_p0, %p1415_p5 }
  0x1d   : > { %s2310_s29 = scalar_select %p1438_p12, 1, 0 }
  0x1e   : > { %p1118_p1 = pneg %p1438_p12 }
  0x1f   : > { %s149_s28 = sshll.u32 %s2309_s1, 4  ;;  %s150_s28 = int_to_ptr.vmem [resolvable:$true] %s149_s28 }
  0x20   : > { %s2312_s6 = scalar_select %p1451_p2, 1, 0 }
  0x21   : > { %s160_s5 = sshll.u32 %s2311_s2, 4  ;;  %p1457_p4 = pnand %p1118_p1, %p1411_p3  ;;  %s161_s5 = int_to_ptr.vmem [resolvable:$true] %s160_s5 }
  0x22   : > { %s1195_s8 = scalar_lea.vmem %s150_s28, 32  ;;  %p1203_p9 = scmp.lt.s32.totalorder %s150_s28, %s150_s28 }
  0x23   : > { %p1196_p6 = scmp.ne.s32.totalorder %s150_s28, %s1195_s8  ;;  %p1197_p10 = pneg %p1457_p4 }
  0x24   : > { %p1204_p8 = scmp.lt.s32.totalorder %s1195_s8, %s1195_s8 }
  0x25   : > { %p1198_p11 = pnand %p1197_p10, %p1196_p6 }
  0x26   : > { %p1205_p7 = por %p1204_p8, %p1203_p9 }
  0x27   : > { %p1199_p13 = pneg %p1198_p11 }
  0x29   : > { %p1206_p5 = pnand %p1205_p7, %p1199_p13 }
  0x2b   : > { %1209 = shalt.err (!%p1206_p5)
}
  0x2c   : > { %s1347_s9 = smov [#allocation6]   ;;  %s1210_s10 = scalar_lea.vmem %s161_s5, 16 }
  0x2d   : > { %1121 = dma.vmem_to_smem (!%p1457_p4), %s150_s28, 32, %s1347_s9, [#allocation5]  }
  0x2e   : > { %p1211_p0 = scmp.ne.s32.totalorder %s161_s5, %s1210_s10  ;;  %p1218_p12 = scmp.lt.s32.totalorder %s161_s5, %s161_s5 }
  0x2f   : > { %p1219_p2 = scmp.lt.s32.totalorder %s1210_s10, %s1210_s10 }
  0x30   : > { %p1213_p1 = pnand %p1211_p0, %p1197_p10 }
  0x31   : > { %p1220_p6 = por %p1219_p2, %p1218_p12 }
  0x32   : > { %p1214_p3 = pneg %p1213_p1 }
  0x34   : > { %p1221_p11 = pnand %p1220_p6, %p1214_p3 }
  0x36   : > { %1224 = shalt.err (!%p1221_p11)
}
  0x37   : > { %s1348_s11 = smov [#allocation7]   ;;  %s33_s18 = sadd.s32 1, %s1341_s16 }
  0x38   : > { %1124 = dma.vmem_to_smem (!%p1457_p4), %s161_s5, 16, %s1348_s11, [#allocation8]  }
  0x39   : > { %s171_s19 = sand.u32 1, %s1333_s14   ;;  %p35_p7 = scmp.ge.s32.totalorder %s33_s18, 2 }
  0x3a   : > { %s943_s22 = sshll.u32 %s171_s19, 3  ;;  %s1105_s26 = sshll.u32 %s1341_s16, 7 }
  0x3b   : > { %s2332_s18 = smov (%p35_p7, %s33_s18), 0  ;;  %s2315_s0 = sld [smem:[#allocation21_spill]] }
  0x3c   : > { %2314 = sst [smem:[#allocation19_spill]] %s2332_s18  ;;  %s37_s4 = ssub.s32 %s1341_s16, %s2332_s18 }
  0x3d   : > { %s175_s5 = scalar_lea.vmem [#allocation2], %s943_s22  ;;  %p40_p3 = scmp.eq.s32.totalorder %s37_s4, 0 }
  0x3e   : > { %s183_s7 = sshll.u32 %s175_s5, 4  ;;  %s1486_s9 = scalar_lea.sflag [#allocation3], %s171_s19  ;;  %s1479_s7 = int_to_ptr.vmem [resolvable:$true] %s183_s7 }
  0x3f   : > { %s1484_s8 = scalar_select %p40_p3, %s1333_s14, %s42_s20  }
  0x40   : > { %p2317_p9 = scmp.ne.s32.totalorder %s2312_s6, 0 }
  0x41   : > { %s1475_s30 = scalar_lea.hbm %s2315_s0, %s1105_s26  ;;  %2316 = sst [smem:[#allocation20_spill]] %s1484_s8 }
  0x42   : > { %s1225_s10 = scalar_lea.hbm %s1475_s30, 128  ;;  %p1227_p12 = pneg %p2317_p9 }
  0x43   : > { %p1226_p8 = scmp.ne.s32.totalorder %s1475_s30, %s1225_s10  ;;  %s1230_s22 = scalar_lea.hbm %s2315_s0, 256 }
  0x44   : > { %p1231_p4 = scmp.lt.u32.totalorder %s1475_s30, %s2315_s0  ;;  %p1232_p10 = scmp.lt.u32.totalorder %s1230_s22, %s1225_s10 }
  0x45   : > { %p1228_p13 = pnand %p1227_p12, %p1226_p8  ;;  %p1234_p0 = scmp.lt.u32.totalorder %s1225_s10, %s1475_s30 }
  0x46   : > { %p1233_p5 = por %p1232_p10, %p1231_p4 }
  0x47   : > { %p1229_p2 = pneg %p1228_p13 }
  0x48   : > { %p1235_p1 = por %p1234_p0, %p1233_p5 }
  0x4a   : > { %p1236_p6 = pnand %p1235_p1, %p1229_p2 }
  0x4c   : > { %1239 = shalt.err (!%p1236_p6)
}
  0x4d   : > { %s1240_s20 = scalar_lea.vmem %s1479_s7, 128  ;;  %s1349_s19 = smov [#allocation2]  }
  0x4e   : > { %p1241_p11 = scmp.ne.s32.totalorder %s1479_s7, %s1240_s20  ;;  %s1245_s4 = sshll.u32 %s1349_s19, 4  ;;  %s1246_s4 = int_to_ptr.vmem [resolvable:$false] %s1245_s4 }
  0x4f   : > { %s1247_s5 = scalar_lea.vmem %s1246_s4, 256  ;;  %p1248_p8 = scmp.lt.s32.totalorder %s1479_s7, %s1246_s4 }
  0x50   : > { %p1243_p7 = pnand %p1241_p11, %p1227_p12  ;;  %p1249_p13 = scmp.lt.s32.totalorder %s1247_s5, %s1240_s20 }
  0x52   : > { %p1244_p3 = pneg %p1243_p7  ;;  %p1250_p4 = por %p1249_p13, %p1248_p8 }
  0x54   : > { %p1251_p10 = pnand %p1250_p4, %p1244_p3 }
  0x56   : > { %1254 = shalt.err (!%p1251_p10)
}
  0x57   : > { %s1350_s10 = smov 32   ;;  %s1351_s11 = smov 2  }
  0x58   : > { %1128 = dma.hbm_to_vmem [thread:$0]  (!%p2317_p9), %s1475_s30, 128, %s1479_s7, %s1486_s9, %s1350_s10, %s1350_s10, %s1351_s11  }
  0x59   : > { %p2318_p12 = scmp.ne.s32.totalorder %s2310_s29, 0 }
  0x5a   : > { %s1517_s26 = sand.u32 (!%p2318_p12), 1, %s1329_s13   ;;  %p2319_p2 = scmp.ne.s32.totalorder (!%p2318_p12), %s2305_s23, 0 }
  0x5b   : > { %195 = sbr.rel (%p2318_p12) target bundleno = 253 (0xfd), region = 32  ;;  %s947_s22 = sshll.u32 (!%p2318_p12), %s1517_s26, 3 }
  0x5c   : > { %s198_s27 = scalar_lea.sflag (!%p2318_p12), [#allocation3], %s1517_s26  ;;  %s1521_s28 = scalar_lea.vmem (!%p2318_p12), [#allocation2], %s947_s22 }
  0x62   : > { %1308 = dma.done.wait (%p2319_p2), %s198_s27, 128  }
  0x63   : > { %1310 = vsyncadd (%p2319_p2), %s198_s27, 4294967168  ;;  %p2320_p9 = scmp.ne.s32.totalorder %s2303_s21, 0 }
  0x65   : > { %1312 = dma.done.wait (%p2320_p9), [#allocation5], 32  }
  0x66   : > { %1314 = vsyncadd (%p2320_p9), [#allocation5], 4294967264 }
  0x67   : > { %1316 = dma.done.wait (%p2320_p9), [#allocation8], 16  }
  0x68   : > { %1318 = vsyncadd (%p2320_p9), [#allocation8], 4294967280 }
  0x69   : > { %214 = sfence }
  0x6a   : > { %s1011_s29 = sld [smem:[#allocation6 + $0x3d]]  ;;  %s1013_s6 = sld [smem:[#allocation6 + $0x3f]]  ;;  %v1536_v0 = vld [vmem:[%s1521_s28 + $0x2] sm:$0x3]  ;;  %v1540_v3 = vld [vmem:[%s1521_s28 + $0x6] sm:$0x3] }
  0x6b   : > { %s1020_s30 = sld [smem:[#allocation6 + $0x46]]  ;;  %s1022_s23 = sld [smem:[#allocation6 + $0x48]]  ;;  %v1584_v21 = vld [vmem:[%s1521_s28] sm:$0x3]  ;;  %v1591_v22 = vld [vmem:[%s1521_s28 + $0x4] sm:$0x3] }
  0x6c   : > { %s1029_s7 = sld [smem:[#allocation6 + $0x4f]]  ;;  %s1031_s21 = sld [smem:[#allocation6 + $0x51]] }
  0x6d   : > { %s1039_s9 = sld [smem:[#allocation6 + $0x59]]  ;;  %s1547_s20 = sld [smem:[#allocation6]] }
  0x6e   : > { %s1041_s19 = sld [smem:[#allocation6 + $0x5b]]  ;;  %s1551_s4 = sld [smem:[#allocation6 + $0x1]] }
  0x6f   : > { %s1553_s5 = sld [smem:[#allocation6 + $0x2]]  ;;  %s1556_s10 = sld [smem:[#allocation6 + $0x3]] }
  0x70   : > { %v596_v1 = vstv %s1011_s29  ;;  %v610_v4 = vstv %s1013_s6  ;;  %s1558_s11 = sld [smem:[#allocation6 + $0x4]]  ;;  %s1561_s22 = sld [smem:[#allocation6 + $0x5]] }
  0x71   : > { %v597_v2 = vmul.f32 %v1536_v0, %v596_v1  ;;  %v611_v5 = vmul.f32 %v1540_v3, %v610_v4  ;;  %v602_v6 = vstv %s1020_s30  ;;  %v613_v9 = vstv %s1022_s23  ;;  %s1563_s27 = sld [smem:[#allocation6 + $0x6]]  ;;  %s1565_s29 = sld [smem:[#allocation6 + $0x7]] }
  0x72   : > { %v603_v8 = vmul.f32 %v1536_v0, %v602_v6  ;;  %v614_v10 = vmul.f32 %v1540_v3, %v613_v9  ;;  %v653_v12 = vstv %s1029_s7  ;;  %v667_v14 = vstv %s1031_s21  ;;  %s1049_s6 = sld [smem:[#allocation6 + $0x63]]  ;;  %s1569_s30 = sld [smem:[#allocation6 + $0x65]] }
  0x73   : > { %v1543_v7 = vadd.f32 %v611_v5, %v597_v2  ;;  %v654_v13 = vmul.f32 %v1536_v0, %v653_v12  ;;  %v668_v15 = vmul.f32 %v1540_v3, %v667_v14  ;;  %v659_v17 = vstv %s1039_s9  ;;  %s1571_s23 = sld [smem:[#allocation6 + $0x8]]  ;;  %s1574_s7 = sld [smem:[#allocation6 + $0x9]] }
  0x74   : > { %v1549_v11 = vadd.f32 %v614_v10, %v603_v8  ;;  %v660_v18 = vmul.f32 %v1536_v0, %v659_v17  ;;  %v670_v19 = vstv %s1041_s19  ;;  %s1576_s21 = sld [smem:[#allocation6 + $0xa]]  ;;  %s1579_s0 = sld [smem:[#allocation6 + $0xb]]  ;;  %v389_v23 = vstv %s1547_s20 }
  0x75   : > { %v1567_v16 = vadd.f32 %v668_v15, %v654_v13  ;;  %v671_v20 = vmul.f32 %v1540_v3, %v670_v19  ;;  %s1581_s1 = sld [smem:[#allocation6 + $0xd]]  ;;  %s1586_s9 = sld [smem:[#allocation6 + $0xe]]  ;;  %v393_v25 = vstv %s1551_s4  ;;  %v401_v26 = vstv %s1553_s5 }
  0x76   : > { %s1588_s2 = sld [smem:[#allocation6 + $0x10]]  ;;  %s1596_s19 = sld [smem:[#allocation6 + $0xf]]  ;;  %v407_v27 = vstv %s1556_s10  ;;  %v395_v29 = vstv %s1558_s11  ;;  %v399_v30 = vstv %s1561_s22  ;;  %v1619_v36 = vmul.f32 %v389_v23, %v1584_v21 }
  0x77   : > { %v1594_v24 = vadd.f32 %v671_v20, %v660_v18  ;;  %s1598_s18 = sld [smem:[#allocation6 + $0x6e]]  ;;  %s1603_s16 = sld [smem:[#allocation6 + $0x70]]  ;;  %v404_v33 = vstv %s1563_s27  ;;  %v410_v34 = vstv %s1565_s29  ;;  %v394_v37 = vmul.f32 %v1536_v0, %v393_v25 }
  0x78   : > { %v716_v28 = vstv %s1049_s6  ;;  %v730_v32 = vstv %s1569_s30  ;;  %s1609_s28 = sld [smem:[#allocation6 + $0xc]]  ;;  %s1614_s20 = sld [smem:[#allocation6 + $0x12]]  ;;  %v1623_v38 = vmul.f32 %v1591_v22, %v401_v26  ;;  %v1630_v39 = vmul.f32 %v395_v29, %v1584_v21 }
  0x79   : > { %v717_v31 = vmul.f32 %v1536_v0, %v716_v28  ;;  %v731_v35 = vmul.f32 %v1540_v3, %v730_v32  ;;  %s1616_s4 = sld [smem:[#allocation6 + $0x13]]  ;;  %s1625_s5 = sld [smem:[#allocation6 + $0x14]]  ;;  %v400_v40 = vmul.f32 %v1536_v0, %v399_v30  ;;  %v408_v41 = vmul.f32 %v1540_v3, %v407_v27 }
  0x7a   : > { %s1627_s10 = sld [smem:[#allocation6 + $0x15]]  ;;  %s1636_s11 = sld [smem:[#allocation6 + $0x18]]  ;;  %v1641_v43 = vmul.f32 %v1591_v22, %v404_v33  ;;  %v411_v44 = vmul.f32 %v1540_v3, %v410_v34  ;;  %v416_v45 = vstv %s1571_s23  ;;  %v420_v46 = vstv %s1574_s7 }
  0x7b   : > { %v1634_v42 = vadd.f32 %v731_v35, %v717_v31  ;;  %s1638_s22 = sld [smem:[#allocation6 + $0x79]]  ;;  %s1648_s29 = sld [smem:[#allocation6 + $0x7b]]  ;;  %v422_v47 = vstv %s1581_s1  ;;  %v428_v48 = vstv %s1576_s21  ;;  %v434_v49 = vstv %s1579_s0 }
  0x7c   : > { %s1646_s27 = sld [smem:[#allocation6 + $0x11]]  ;;  %s1654_s6 = sld [smem:[#allocation6 + $0x16]]  ;;  %v426_v51 = vstv %s1586_s9  ;;  %v437_v52 = vstv %s1588_s2  ;;  %v1666_v55 = vadd.f32 %v408_v41, %v394_v37  ;;  %v1669_v56 = vmul.f32 %v416_v45, %v1584_v21 }
  0x7d   : > { %v722_v50 = vstv %s1598_s18  ;;  %s1656_s30 = sld [smem:[#allocation6 + $0x19]]  ;;  %v733_v54 = vstv %s1603_s16  ;;  %s1662_s23 = sld [smem:[#allocation6 + $0x17]]  ;;  %v431_v57 = vstv %s1596_s19  ;;  %v1677_v59 = vadd.f32 %v411_v44, %v400_v40 }
  0x7e   : > { %v723_v53 = vmul.f32 %v1536_v0, %v722_v50  ;;  %s1664_s7 = sld [smem:[#allocation6 + $0x1b]]  ;;  %v734_v58 = vmul.f32 %v1540_v3, %v733_v54  ;;  %s1673_s0 = sld [smem:[#allocation6 + $0x1a]]  ;;  %v421_v60 = vmul.f32 %v1536_v0, %v420_v46  ;;  %v1681_v61 = vmul.f32 %v1591_v22, %v428_v48 }
  0x7f   : > { %s1675_s1 = sld [smem:[#allocation6 + $0x3c]]  ;;  %v435_v62 = vmul.f32 %v1540_v3, %v434_v49  ;;  %s1684_s2 = sld [smem:[#allocation6 + $0x3e]]  ;;  %v423_v63 = vmul.f32 %v422_v47, %v1584_v21  ;;  %v427_v1 = vmul.f32 %v1536_v0, %v426_v51  ;;  %v438_v2 = vmul.f32 %v1540_v3, %v437_v52 }
  0x80   : > { %v1689_v4 = vadd.f32 %v734_v58, %v723_v53  ;;  %s1691_s16 = sld [smem:[#allocation7]]  ;;  %s1693_s18 = sld [smem:[#allocation7 + $0x1]]  ;;  %v1696_v5 = vmul.f32 %v1591_v22, %v431_v57  ;;  %v449_v6 = vstv %s1614_s20  ;;  %v453_v8 = vstv %s1616_s4 }
  0x81   : > { %v785_v9 = vstv %s1638_s22  ;;  %s1701_s21 = sld [smem:[#allocation7 + $0x2]]  ;;  %s1703_s9 = sld [smem:[#allocation7 + $0x3]]  ;;  %v461_v10 = vstv %s1625_s5  ;;  %v467_v12 = vstv %s1627_s10  ;;  %v790_v14 = vstv %s1648_s29 }
  0x82   : > { %v786_v13 = vmul.f32 %v1536_v0, %v785_v9  ;;  %s1709_s19 = sld [smem:[#allocation6 + $0x1c]]  ;;  %s1711_s8 = sld [smem:[#allocation6 + $0x1d]]  ;;  %v1713_v15 = vadd.f32 %v435_v62, %v421_v60  ;;  %v440_v17 = vstv %s1609_s28  ;;  %v455_v18 = vstv %s1636_s11 }
  0x83   : > { %v791_v19 = vmul.f32 %v1540_v3, %v790_v14  ;;  %s1718_s20 = sld [smem:[#allocation6 + $0x45]]  ;;  %v1722_v20 = vadd.f32 %v438_v2, %v427_v1  ;;  %v443_v23 = vstv %s1646_s27  ;;  %v1726_v25 = vmul.f32 %v449_v6, %v1584_v21  ;;  %s1731_s10 = sld [smem:[#allocation6 + $0x47]] }
  0x84   : > { %s1720_s4 = sld [smem:[#allocation7 + $0x5]]  ;;  %v454_v26 = vmul.f32 %v1536_v0, %v453_v8  ;;  %v459_v27 = vstv %s1656_s30  ;;  %v1735_v28 = vmul.f32 %v1591_v22, %v461_v10  ;;  %v468_v29 = vmul.f32 %v1540_v3, %v467_v12  ;;  %s1740_s11 = sld [smem:[#allocation7 + $0xa]] }
  0x85   : > { %s1729_s5 = sld [smem:[#allocation6 + $0x25]]  ;;  %v1738_v30 = vadd.f32 %v791_v19, %v786_v13  ;;  %v456_v31 = vmul.f32 %v455_v18, %v1584_v21  ;;  %v470_v32 = vstv %s1664_s7  ;;  %v473_v33 = vstv %s1654_s6  ;;  %s1746_s22 = sld [smem:[#allocation6 + $0x4e]] }
  0x86   : > { %v479_v34 = vstv %s1662_s23  ;;  %s1748_s29 = sld [smem:[#allocation6 + $0x50]]  ;;  %v391_v35 = vstv %s1691_s16  ;;  %v397_v37 = vstv %s1693_s18  ;;  %v464_v40 = vstv %s1673_s0  ;;  %s1760_s7 = sld [smem:[#allocation6 + $0x27]] }
  0x87   : > { %v592_v41 = vstv %s1675_s1  ;;  %s1754_s30 = sld [smem:[#allocation6 + $0x58]]  ;;  %v392_v44 = vadd.f32 %v391_v35, %v1619_v36  ;;  %v398_v45 = vadd.f32 %v397_v37, %v1630_v39  ;;  %v418_v46 = vstv %s1701_s21  ;;  %s1762_s14 = sld [smem:[#allocation7 + $0xb]] }
  0x88   : > { %v424_v47 = vstv %s1703_s9  ;;  %v460_v48 = vmul.f32 %v1536_v0, %v459_v27  ;;  %v1765_v49 = vadd.f32 %v468_v29, %v454_v26  ;;  %v471_v50 = vmul.f32 %v1540_v3, %v470_v32  ;;  %s1769_s0 = sld [smem:[#allocation6 + $0x5a]]  ;;  %s1788_s18 = sld [smem:[#allocation6 + $0x64]] }
  0x89   : > { %v604_v51 = vstv %s1684_s2  ;;  %v403_v36 = vadd.f32 %v1623_v38, %v392_v44  ;;  %v406_v39 = vadd.f32 %v1641_v43, %v398_v45  ;;  %v419_v52 = vadd.f32 %v418_v46, %v1669_v56  ;;  %s1774_s1 = sld [smem:[#allocation6 + $0x52]]  ;;  %s1780_s2 = sld [smem:[#allocation6 + $0x5c]] }
  0x8a   : > { %v425_v53 = vadd.f32 %v424_v47, %v423_v63  ;;  %v465_v54 = vmul.f32 %v1591_v22, %v464_v40  ;;  %v476_v57 = vstv %s1709_s19  ;;  %v482_v58 = vstv %s1711_s8  ;;  %s1782_s16 = sld [smem:[#allocation6 + $0x62]]  ;;  %s1790_s21 = sld [smem:[#allocation6 + $0x6d]] }
  0x8b   : > { %v593_v60 = vmul.f32 %v592_v41, %v1584_v21  ;;  %v413_v38 = vadd.f32 %v1666_v55, %v403_v36  ;;  %v414_v43 = vadd.f32 %v1677_v59, %v406_v39  ;;  %v457_v56 = vstv %s1720_s4  ;;  %s1797_s9 = sld [smem:[#allocation7 + $0xc]]  ;;  %s1799_s19 = sld [smem:[#allocation7 + $0xd]] }
  0x8c   : > { %v598_v62 = vstv %s1718_s20  ;;  %v1792_v63 = vadd.f32 %v471_v50, %v460_v48  ;;  %v498_v1 = vstv %s1729_s5  ;;  %v605_v2 = vmul.f32 %v1591_v22, %v604_v51  ;;  %s1806_s20 = sld [smem:[#allocation6 + $0x6f]]  ;;  %s1808_s4 = sld [smem:[#allocation7 + $0x4]] }
  0x8d   : > { %v607_v6 = vstv %s1731_s10  ;;  %v1801_v55 = vmul.f32 %v414_v43, %v413_v38  ;;  %v430_v59 = vadd.f32 %v1681_v61, %v419_v52  ;;  %v433_v8 = vadd.f32 %v1696_v5, %v425_v53  ;;  %s1820_s5 = sld [smem:[#allocation6 + $0x66]]  ;;  %s1822_s10 = sld [smem:[#allocation6 + $0x67]] }
  0x8e   : > { %v594_v9 = vstv %s1740_s11  ;;  %v458_v10 = vadd.f32 %v457_v56, %v456_v31  ;;  %v599_v12 = vmul.f32 %v598_v62, %v1584_v21  ;;  %v649_v13 = vstv %s1746_s22  ;;  %s1830_s11 = sld [smem:[#allocation6 + $0x78]]  ;;  %s1832_s28 = sld [smem:[#allocation6 + $0x7a]] }
  0x8f   : > { %v661_v14 = vstv %s1748_s29  ;;  %v441_v18 = vmul.f32 %v440_v17, %v1801_v55  ;;  %v444_v61 = vmul.f32 %v443_v23, %v1801_v55  ;;  %v595_v19 = vadd.f32 %v594_v9, %v593_v60  ;;  %s1836_s27 = sld [smem:[#allocation6 + $0x71]]  ;;  %s1847_s22 = sld [smem:[#allocation6 + $0x7c]] }
  0x90   : > { %v655_v5 = vstv %s1754_s30  ;;  %v1825_v26 = vmul.f32 %v498_v1, %v1584_v21  ;;  %v507_v27 = vstv %s1760_s7  ;;  %v600_v29 = vstv %s1762_s14  ;;  %s1841_s14 = sld [smem:[#allocation6 + $0x72]]  ;;  %s1853_s29 = sld [smem:[#allocation7 + $0xe]] }
  0x91   : > { %v608_v31 = vmul.f32 %v1591_v22, %v607_v6  ;;  %v442_v17 = vadd.f32 %v441_v18, %v430_v59  ;;  %v445_v23 = vadd.f32 %v444_v61, %v433_v8  ;;  %v650_v32 = vmul.f32 %v649_v13, %v1584_v21  ;;  %s1855_s30 = sld [smem:[#allocation7 + $0xf]]  ;;  %s1938_s6 = sld [smem:[#allocation6 + $0x2b]] }
  0x92   : > { %v664_v35 = vstv %s1769_s0  ;;  %v466_v37 = vadd.f32 %v465_v54, %v458_v10  ;;  %v477_v40 = vmul.f32 %v476_v57, %v1801_v55  ;;  %v656_v41 = vmul.f32 %v655_v5, %v1584_v21  ;;  %s1863_s0 = sld [smem:[#allocation6 + $0x7d]]  ;;  %s1886_s8 = sld [smem:[#allocation7 + $0x7]] }
  0x93   : > { %v662_v44 = vmul.f32 %v1591_v22, %v661_v14  ;;  %v446_v45 = vadd.f32 %v442_v17, %v1713_v15  ;;  %v447_v46 = vadd.f32 %v445_v23, %v1722_v20  ;;  %v601_v47 = vadd.f32 %v600_v29, %v599_v12  ;;  %s1944_s23 = sld [smem:[#allocation6 + $0x1f]]  ;;  %s1967_s7 = sld [smem:[#allocation6 + $0x2c]] }
  0x94   : > { %v1845_v48 = vadd.f32 %v605_v2, %v595_v19  ;;  %v665_v50 = vmul.f32 %v1591_v22, %v664_v35  ;;  %v673_v51 = vstv %s1774_s1  ;;  %v712_v36 = vstv %s1782_s16  ;;  %s1872_s1 = sld [smem:[#allocation7 + $0x10]]  ;;  %s2026_s13 = sld [smem:[#allocation6 + $0x42]] }
  0x95   : > { %v724_v39 = vstv %s1788_s18  ;;  %v1857_v15 = vmul.f32 %v447_v46, %v446_v45  ;;  %v1859_v20 = vadd.f32 %v608_v31, %v601_v47  ;;  %v651_v52 = vstv %s1797_s9  ;;  %s1895_s16 = sld [smem:[#allocation6 + $0x28]]  ;;  %s1905_s18 = sld [smem:[#allocation6 + $0x29]] }
  0x96   : > { %v657_v53 = vstv %s1799_s19  ;;  %v451_v54 = vstv %s1808_s4  ;;  %v676_v57 = vstv %s1780_s2  ;;  %v718_v60 = vstv %s1790_s21  ;;  %s1893_s2 = sld [smem:[#allocation6 + $0x26]]  ;;  %s1913_s21 = sld [smem:[#allocation6 + $0x2a]] }
  0x97   : > { %v727_v38 = vstv %s1806_s20  ;;  %v478_v43 = vadd.f32 %v477_v40, %v466_v37  ;;  %v483_v56 = vmul.f32 %v482_v58, %v1857_v15  ;;  %v652_v62 = vadd.f32 %v651_v52, %v650_v32  ;;  %s1936_s9 = sld [smem:[#allocation6 + $0x1e]]  ;;  %s1946_s19 = sld [smem:[#allocation6 + $0x21]] }
  0x98   : > { %v658_v1 = vadd.f32 %v657_v53, %v656_v41  ;;  %v713_v2 = vmul.f32 %v712_v36, %v1584_v21  ;;  %v725_v6 = vmul.f32 %v1591_v22, %v724_v39  ;;  %v736_v59 = vstv %s1820_s5  ;;  %s1953_s20 = sld [smem:[#allocation6 + $0x20]]  ;;  %s1956_s4 = sld [smem:[#allocation6 + $0x22]] }
  0x99   : > { %v742_v8 = vstv %s1822_s10  ;;  %v484_v9 = vadd.f32 %v483_v56, %v1792_v63  ;;  %v674_v10 = vmul.f32 %v673_v51, %v1801_v55  ;;  %v781_v12 = vstv %s1830_s11  ;;  %s1958_s5 = sld [smem:[#allocation7 + $0x6]]  ;;  %s1962_s10 = sld [smem:[#allocation6 + $0x23]] }
  0x9a   : > { %v787_v13 = vstv %s1832_s28  ;;  %v452_v58 = vadd.f32 %v451_v54, %v1726_v25  ;;  %v719_v14 = vmul.f32 %v718_v60, %v1584_v21  ;;  %v728_v18 = vmul.f32 %v1591_v22, %v727_v38  ;;  %s1964_s11 = sld [smem:[#allocation6 + $0x24]]  ;;  %s1969_s28 = sld [smem:[#allocation6 + $0x2d]] }
  0x9b   : > { %v739_v61 = vstv %s1836_s27  ;;  %v486_v19 = vadd.f32 %v484_v9, %v478_v43  ;;  %v663_v5 = vadd.f32 %v662_v44, %v652_v62  ;;  %v666_v63 = vadd.f32 %v665_v50, %v658_v1  ;;  %s1972_s27 = sld [smem:[#allocation6 + $0x2e]]  ;;  %s2028_s17 = sld [smem:[#allocation6 + $0x43]] }
  0x9c   : > { %v745_v29 = vstv %s1841_s14  ;;  %v677_v31 = vmul.f32 %v676_v57, %v1801_v55  ;;  %v782_v17 = vmul.f32 %v781_v12, %v1584_v21  ;;  %v788_v25 = vmul.f32 %v1591_v22, %v787_v13  ;;  %s1974_s14 = sld [smem:[#allocation6 + $0x2f]]  ;;  %s2037_s25 = sld [smem:[#allocation6 + $0x49]] }
  0x9d   : > { %v793_v23 = vstv %s1847_s22  ;;  %1191 = vrcp.f32 %v486_v19  ;;  %v1897_v32 = vadd.f32 %v674_v10, %v663_v5  ;;  %v714_v35 = vstv %s1853_s29  ;;  %s1976_s22 = sld [smem:[#allocation6 + $0x30]]  ;;  %s1978_s29 = sld [smem:[#allocation6 + $0x31]] }
  0x9e   : > { %v720_v37 = vstv %s1855_s30  ;;  %v463_v40 = vadd.f32 %v1735_v28, %v452_v58  ;;  %v1902_v41 = vadd.f32 %v677_v31, %v666_v63  ;;  %v715_v44 = vadd.f32 %v714_v35, %v713_v2  ;;  %s1982_s30 = sld [smem:[#allocation6 + $0x35]]  ;;  %p2321_p0 = scmp.ne.s32.totalorder %s2306_s24, 0 }
  0x9f   : > { %v796_v45 = vstv %s1863_s0  ;;  %v721_v46 = vadd.f32 %v720_v37, %v719_v14  ;;  %v737_v47 = vmul.f32 %v736_v59, %v1801_v55  ;;  %v740_v50 = vmul.f32 %v739_v61, %v1801_v55  ;;  %s1984_s0 = sld [smem:[#allocation6 + $0x37]] }
  0xa0   : > { %v743_v51 = vmul.f32 %v742_v8, %v1857_v15  ;;  %v726_v36 = vadd.f32 %v725_v6, %v715_v44  ;;  %v746_v39 = vmul.f32 %v745_v29, %v1857_v15  ;;  %v783_v28 = vstv %s1872_s1  ;;  %s1987_s1 = sld [smem:[#allocation6 + $0x32]] }
  0xa1   : > { %v794_v52 = vmul.f32 %v793_v23, %v1801_v55  ;;  %v729_v53 = vadd.f32 %v728_v18, %v721_v46  ;;  %v784_v57 = vadd.f32 %v783_v28, %v782_v17  ;;  %v797_v60 = vmul.f32 %v796_v45, %v1857_v15 }
  0xa2   : > { %v1916_v54 = vadd.f32 %v743_v51, %v1634_v42  ;;  %v474_v38 = vmul.f32 %v473_v33, %v1801_v55  ;;  %v480_v43 = vmul.f32 %v479_v34, %v1857_v15  ;;  %v1925_v56 = vadd.f32 %v737_v47, %v726_v36 }
  0xa3   : > { %v1928_v62 = vadd.f32 %v746_v39, %v1689_v4  ;;  %v500_v1 = vstv %s1886_s8  ;;  %v1931_v2 = vadd.f32 %v740_v50, %v729_v53  ;;  %v789_v42 = vadd.f32 %v788_v25, %v784_v57  ;;  %s1989_s8 = sld [smem:[#allocation6 + $0x34]] }
  0xa4   : > { %v1934_v6 = vadd.f32 %v797_v60, %v1738_v30  ;;  %v502_v33 = vstv %s1893_s2  ;;  %v513_v34 = vstv %s1895_s16  ;;  %v475_v4 = vadd.f32 %v474_v38, %v463_v40  ;;  %s1995_s2 = sld [smem:[#allocation6 + $0x33]]  ;;  %s1997_s16 = sld [smem:[#allocation6 + $0x36]] }
  0xa5   : > { %v1942_v59 = vadd.f32 %v794_v52, %v789_v42  ;;  %v481_v8 = vadd.f32 %v480_v43, %v1765_v49  ;;  %v501_v9 = vadd.f32 %v500_v1, %v1825_v26  ;;  %v508_v30 = vmul.f32 %v1591_v22, %v507_v27 }
  0xa6   : > { %v519_v12 = vstv %s1905_s18  ;;  %v503_v58 = vmul.f32 %v1536_v0, %v502_v33  ;;  %v514_v14 = vmul.f32 %v1540_v3, %v513_v34  ;;  %v525_v49 = vstv %s1913_s21  ;;  %s2001_s18 = sld [smem:[#allocation6 + $0x38]]  ;;  %s2003_s21 = sld [smem:[#allocation6 + $0x39]] }
  0xa7   : > { %v1192_v10 = vpop.eup %1191  ;;  %v485_v26 = vadd.f32 %v481_v8, %v475_v4  ;;  %v509_v18 = vadd.f32 %v508_v30, %v501_v9  ;;  %v520_v61 = vmul.f32 %v519_v12, %v1801_v55  ;;  %v492_v5 = vstv %s1936_s9  ;;  %s2007_s9 = sld [smem:[#allocation6 + $0x3a]] }
  0xa8   : > { %v488_v13 = vmul.f32 %v1192_v10, %v486_v19  ;;  %v515_v63 = vadd.f32 %v514_v14, %v503_v58  ;;  %v526_v29 = vmul.f32 %v525_v49, %v1857_v15  ;;  %v531_v31 = vstv %s1938_s6  ;;  %s2009_s6 = sld [smem:[#allocation7 + $0x8]] }
  0xa9   : > { %v496_v25 = vstv %s1944_s23  ;;  %v510_v23 = vstv %s1946_s19  ;;  %v521_v35 = vadd.f32 %v520_v61, %v509_v18  ;;  %v493_v37 = vmul.f32 %v492_v5, %v1584_v21  ;;  %s2013_s23 = sld [smem:[#allocation6 + $0x3b]]  ;;  %s2015_s19 = sld [smem:[#allocation7 + $0x9]] }
  0xaa   : > { %v489_v27 = vsub.f32 2.0, %v488_v13  ;;  %v504_v40 = vstv %s1953_s20  ;;  %v494_v44 = vstv %s1958_s5  ;;  %v527_v45 = vadd.f32 %v526_v29, %v515_v63  ;;  %s2019_s20 = sld [smem:[#allocation6 + $0x40]]  ;;  %s2021_s5 = sld [smem:[#allocation6 + $0x41]] }
  0xab   : > { %v497_v47 = vmul.f32 %v1536_v0, %v496_v25  ;;  %v511_v50 = vmul.f32 %v1540_v3, %v510_v23  ;;  %v505_v51 = vmul.f32 %v1591_v22, %v504_v40  ;;  %v541_v39 = vstv %s1967_s7  ;;  %s2035_s7 = sld [smem:[#allocation6 + $0x44]] }
  0xac   : > { %v490_v19 = vmul.f32 %v1192_v10, %v489_v27  ;;  %v495_v28 = vadd.f32 %v494_v44, %v493_v37  ;;  %v516_v52 = vstv %s1956_s4  ;;  %v545_v53 = vstv %s1969_s28  ;;  %s2042_s4 = sld [smem:[#allocation6 + $0x4a]]  ;;  %s2044_s28 = sld [smem:[#allocation6 + $0x4b]] }
  0xad   : > { %v559_v57 = vstv %s1974_s14  ;;  %v522_v60 = vstv %s1962_s10  ;;  %v528_v38 = vstv %s1964_s11  ;;  %v553_v1 = vstv %s1972_s27  ;;  %s2050_s10 = sld [smem:[#allocation6 + $0x4c]]  ;;  %s2052_s11 = sld [smem:[#allocation6 + $0x4d]] }
  0xae   : > { %v1991_v17 = vmul.f32 %v490_v19, %v485_v26  ;;  %v512_v42 = vadd.f32 %v511_v50, %v497_v47  ;;  %v542_v33 = vmul.f32 %v541_v39, %v1584_v21  ;;  %v551_v34 = vstv %s1982_s30  ;;  %s2057_s27 = sld [smem:[#allocation6 + $0x53]]  ;;  %s2059_s14 = sld [smem:[#allocation6 + $0x54]] }
  0xaf   : > { %v562_v4 = vstv %s1984_s0  ;;  %v546_v8 = vmul.f32 %v1536_v0, %v545_v53  ;;  %v547_v9 = vstv %s1989_s8  ;;  %v560_v30 = vmul.f32 %v1540_v3, %v559_v57  ;;  %s2065_s30 = sld [smem:[#allocation6 + $0x55]]  ;;  %s2067_s0 = sld [smem:[#allocation6 + $0x56]] }
  0xb0   : > { %v532_v46 = vmul.f32 %v531_v31, %v1991_v17  ;;  %v506_v10 = vadd.f32 %v505_v51, %v495_v28  ;;  %v517_v12 = vmul.f32 %v516_v52, %v1801_v55  ;;  %v554_v13 = vmul.f32 %v1591_v22, %v553_v1  ;;  %s2073_s8 = sld [smem:[#allocation6 + $0x57]] }
  0xb1   : > { %v556_v58 = vstv %s1997_s16  ;;  %v552_v14 = vmul.f32 %v1536_v0, %v551_v34  ;;  %v563_v49 = vmul.f32 %v1540_v3, %v562_v4  ;;  %v565_v26 = vstv %s1976_s22  ;;  %s2075_s16 = sld [smem:[#allocation6 + $0x5d]]  ;;  %s2082_s22 = sld [smem:[#allocation6 + $0x5e]] }
  0xb2   : > { %v533_v36 = vadd.f32 %v532_v46, %v521_v35  ;;  %v571_v27 = vstv %s1978_s29  ;;  %v543_v18 = vstv %s2009_s6  ;;  %v548_v61 = vmul.f32 %v547_v9, %v1584_v21  ;;  %s2087_s29 = sld [smem:[#allocation6 + $0x5f]]  ;;  %s2104_s6 = sld [smem:[#allocation6 + $0x69]] }
  0xb3   : > { %v577_v19 = vstv %s1987_s1  ;;  %v583_v5 = vstv %s1995_s2  ;;  %v549_v0 = vstv %s2015_s19  ;;  %v557_v3 = vmul.f32 %v1591_v22, %v556_v58  ;;  %s2089_s1 = sld [smem:[#allocation6 + $0x60]]  ;;  %s2127_s19 = sld [smem:[#allocation6 + $0x73]] }
  0xb4   : > { %v2032_v43 = vadd.f32 %v533_v36, %v527_v45  ;;  %v2079_v63 = vadd.f32 %v560_v30, %v546_v8  ;;  %v568_v29 = vstv %s2001_s18  ;;  %v518_v21 = vadd.f32 %v517_v12, %v506_v10  ;;  %s2096_s18 = sld [smem:[#allocation6 + $0x61]]  ;;  %s2165_s2 = sld [smem:[#allocation6 + $0x76]] }
  0xb5   : > { %v523_v31 = vmul.f32 %v522_v60, %v1857_v15  ;;  %v529_v25 = vmul.f32 %v528_v38, %v1991_v17  ;;  %v574_v23 = vstv %s2003_s21  ;;  %v544_v22 = vadd.f32 %v543_v18, %v542_v33  ;;  %s2102_s21 = sld [smem:[#allocation6 + $0x68]] }
  0xb6   : > { %1193 = vrcp.f32 %v2032_v43  ;;  %v564_v35 = vadd.f32 %v563_v49, %v552_v14  ;;  %v580_v37 = vstv %s2007_s9  ;;  %v586_v40 = vstv %s2013_s23  ;;  %s2108_s9 = sld [smem:[#allocation6 + $0x6a]]  ;;  %s2167_s23 = sld [smem:[#allocation6 + $0x80]] }
  0xb7   : > { %v550_v44 = vadd.f32 %v549_v0, %v548_v61  ;;  %v616_v45 = vstv %s2019_s20  ;;  %v622_v46 = vstv %s2021_s5  ;;  %v628_v47 = vstv %s2026_s13  ;;  %s2129_s20 = sld [smem:[#allocation6 + $0x74]]  ;;  %s2133_s5 = sld [smem:[#allocation6 + $0x75]] }
  0xb8   : > { %v619_v50 = vstv %s2037_s25  ;;  %v625_v51 = vstv %s2042_s4  ;;  %v634_v36 = vstv %s2028_s17  ;;  %v640_v39 = vstv %s2035_s7  ;;  %s2110_s25 = sld [smem:[#allocation6 + $0x6b]]  ;;  %s2135_s4 = sld [smem:[#allocation6 + $0x7e]] }
  0xb9   : > { %v524_v28 = vadd.f32 %v523_v31, %v512_v42  ;;  %v530_v52 = vadd.f32 %v529_v25, %v518_v21  ;;  %v631_v53 = vstv %s2044_s28  ;;  %v637_v57 = vstv %s2050_s10  ;;  %s2141_s28 = sld [smem:[#allocation6 + $0x7f]]  ;;  %s2173_s13 = sld [smem:[#allocation6 + $0x81]] }
  0xba   : > { %v555_v38 = vadd.f32 %v554_v13, %v544_v22  ;;  %v566_v1 = vmul.f32 %v565_v26, %v1801_v55  ;;  %v643_v33 = vstv %s2052_s11  ;;  %v679_v34 = vstv %s2057_s27  ;;  %s2199_s17 = sld [smem:[#allocation6 + $0x6c]]  ;;  %s2203_s7 = sld [smem:[#allocation6 + $0x77]] }
  0xbb   : > { %v558_v4 = vadd.f32 %v557_v3, %v550_v44  ;;  %v569_v8 = vmul.f32 %v568_v29, %v1801_v55  ;;  %v685_v9 = vstv %s2059_s14  ;;  %v682_v30 = vstv %s2075_s16  ;;  %s2205_s10 = sld [smem:[#allocation6 + $0x82]]  ;;  %s1081_s11 = sld [smem:[#allocation6 + $0x83]] }
  0xbc   : > { %v691_v10 = vstv %s2065_s30  ;;  %v697_v12 = vstv %s2067_s0  ;;  %v703_v58 = vstv %s2073_s8  ;;  %v534_v14 = vadd.f32 %v530_v52, %v524_v28  ;;  %s950_s27 = sshll.u32 %s1517_s26, 1  ;;  %s1102_s14 = sshll.u32 %s1337_s15, 5 }
  0xbd   : > { %v572_v13 = vmul.f32 %v571_v27, %v1857_v15  ;;  %v575_v26 = vmul.f32 %v574_v23, %v1857_v15  ;;  %v567_v18 = vadd.f32 %v566_v1, %v555_v38  ;;  %v688_v61 = vstv %s2082_s22  ;;  %s232_s30 = scalar_lea.vmem [#allocation9], %s950_s27  ;;  %s2230_s22 = scalar_lea.hbm %s2282_s3, %s1102_s14 }
  0xbe   : > { %v694_v0 = vstv %s2087_s29  ;;  %v700_v21 = vstv %s2089_s1  ;;  %v570_v3 = vadd.f32 %v569_v8, %v558_v4  ;;  %v578_v29 = vmul.f32 %v577_v19, %v1991_v17  ;;  %s834_s0 = sshll.u32 %s232_s30, 4  ;;  %s820_s29 = scalar_lea.sflag [#allocation4], %s1517_s26  ;;  %s2232_s0 = int_to_ptr.vmem [resolvable:$true] %s834_s0 }
  0xbf   : > { %v581_v27 = vmul.f32 %v580_v37, %v1991_v17  ;;  %v617_v31 = vmul.f32 %v616_v45, %v1801_v55  ;;  %v620_v25 = vmul.f32 %v619_v50, %v1801_v55  ;;  %v623_v23 = vmul.f32 %v622_v46, %v1857_v15  ;;  %s1255_s1 = scalar_lea.vmem %s2232_s0, 32  ;;  %s1352_s15 = smov [#allocation9]  }
  0xc0   : > { %v1194_v60 = vpop.eup %1193  ;;  %v626_v22 = vmul.f32 %v625_v51, %v1857_v15  ;;  %v573_v44 = vadd.f32 %v572_v13, %v2079_v63  ;;  %v576_v37 = vadd.f32 %v575_v26, %v564_v35  ;;  %v706_v28 = vstv %s2096_s18  ;;  %p1256_p5 = scmp.ne.s32.totalorder %s2232_s0, %s1255_s1  ;;  %s1259_s18 = sshll.u32 %s1352_s15, 4  ;;  %s1260_s18 = int_to_ptr.vmem [resolvable:$false] %s1259_s18 }
  0xc1   : > { %v537_v42 = vmul.f32 %v1194_v60, %v2032_v43  ;;  %v748_v52 = vstv %s2102_s21  ;;  %v760_v38 = vstv %s2108_s9  ;;  %v766_v1 = vstv %s2110_s25  ;;  %s1261_s21 = scalar_lea.vmem %s1260_s18, 64  ;;  %p1262_p11 = scmp.lt.s32.totalorder %s2232_s0, %s1260_s18 }
  0xc2   : > { %v579_v45 = vadd.f32 %v578_v29, %v567_v18  ;;  %v618_v50 = vadd.f32 %v617_v31, %v1845_v48  ;;  %v621_v51 = vadd.f32 %v620_v25, %v1859_v20  ;;  %v624_v63 = vadd.f32 %v623_v23, %v1543_v7  ;;  %p1257_p1 = pnand %p1256_p5, %p2321_p0  ;;  %p1263_p7 = scmp.lt.s32.totalorder %s1261_s21, %s1255_s1 }
  0xc3   : > { %v538_v49 = vsub.f32 2.0, %v537_v42  ;;  %v582_v42 = vadd.f32 %v581_v27, %v570_v3  ;;  %v627_v35 = vadd.f32 %v626_v22, %v1549_v11  ;;  %v680_v48 = vmul.f32 %v679_v34, %v1857_v15 }
  0xc4   : > { %v683_v20 = vmul.f32 %v682_v30, %v1857_v15  ;;  %v689_v7 = vmul.f32 %v688_v61, %v1991_v17  ;;  %v751_v15 = vstv %s2127_s19  ;;  %v763_v34 = vstv %s2133_s5  ;;  %p1258_p6 = pneg %p1257_p1  ;;  %p1264_p3 = por %p1263_p7, %p1262_p11 }
  0xc5   : > { %v539_v43 = vmul.f32 %v1194_v60, %v538_v49  ;;  %v754_v60 = vstv %s2104_s6  ;;  %v802_v61 = vstv %s2141_s28  ;;  %v749_v22 = vmul.f32 %v748_v52, %v1991_v17 }
  0xc6   : > { %v690_v3 = vadd.f32 %v689_v7, %v1902_v41  ;;  %v805_v52 = vstv %s2167_s23  ;;  %p1265_p8 = pnand %p1264_p3, %p1258_p6 }
  0xc7   : > { %v540_v19 = vmul.f32 %v539_v43, %v534_v14  ;;  %v686_v14 = vmul.f32 %v685_v9, %v1991_v17  ;;  %v799_v9 = vstv %s2135_s4  ;;  %v681_v43 = vadd.f32 %v680_v48, %v1567_v16 }
  0xc9   : > { %v584_v55 = vmul.f32 %v583_v5, %v540_v19  ;;  %v587_v46 = vmul.f32 %v586_v40, %v540_v19  ;;  %v629_v5 = vmul.f32 %v628_v47, %v1991_v17  ;;  %v632_v40 = vmul.f32 %v631_v53, %v1991_v17 }
  0xca   : > { %v635_v47 = vmul.f32 %v634_v36, %v540_v19  ;;  %v638_v13 = vmul.f32 %v637_v57, %v540_v19  ;;  %v757_v53 = vstv %s2129_s20  ;;  %v684_v36 = vadd.f32 %v683_v20, %v1594_v24 }
  0xcb   : > { %v585_v4 = vadd.f32 %v584_v55, %v573_v44  ;;  %v588_v8 = vadd.f32 %v587_v46, %v576_v37  ;;  %v630_v26 = vadd.f32 %v629_v5, %v618_v50  ;;  %v633_v18 = vadd.f32 %v632_v40, %v621_v51 }
  0xcc   : > { %v687_v57 = vadd.f32 %v686_v14, %v1897_v32  ;;  %v636_v29 = vadd.f32 %v635_v47, %v624_v63  ;;  %v639_v27 = vadd.f32 %v638_v13, %v627_v35  ;;  %v692_v23 = vmul.f32 %v691_v10, %v540_v19 }
  0xcd   : > { %v589_v11 = vadd.f32 %v585_v4, %v579_v45  ;;  %v590_v49 = vadd.f32 %v588_v8, %v582_v42  ;;  %v695_v16 = vmul.f32 %v694_v0, %v540_v19  ;;  %v752_v24 = vmul.f32 %v751_v15, %v1991_v17 }
  0xce   : > { %v755_v37 = vmul.f32 %v754_v60, %v540_v19  ;;  %v758_v41 = vmul.f32 %v757_v53, %v540_v19  ;;  %v803_v42 = vmul.f32 %v802_v61, %v540_v19  ;;  %v769_v55 = vstv %s2165_s2 }
  0xcf   : > { %v591_v30 = vmul.f32 %v590_v49, %v589_v11  ;;  %v693_v60 = vadd.f32 %v692_v23, %v681_v43  ;;  %v696_v46 = vadd.f32 %v695_v16, %v684_v36  ;;  %v775_v47 = vstv %s2203_s7 }
  0xd0   : > { %v756_v50 = vadd.f32 %v755_v37, %v1916_v54  ;;  %v759_v51 = vadd.f32 %v758_v41, %v1928_v62  ;;  %v804_v8 = vadd.f32 %v803_v42, %v1934_v6  ;;  %v811_v13 = vstv %s2205_s10 }
  0xd1   : > { %v641_v31 = vmul.f32 %v640_v39, %v591_v30  ;;  %v644_v25 = vmul.f32 %v643_v33, %v591_v30  ;;  %v698_v45 = vmul.f32 %v697_v12, %v591_v30  ;;  %v701_v39 = vmul.f32 %v700_v21, %v591_v30 }
  0xd2   : > { %v800_v33 = vmul.f32 %v799_v9, %v1991_v17  ;;  %v750_v12 = vadd.f32 %v749_v22, %v1925_v56  ;;  %v753_v17 = vadd.f32 %v752_v24, %v1931_v2  ;;  %v808_v21 = vstv %s2173_s13 }
  0xd3   : > { %v642_v44 = vadd.f32 %v641_v31, %v630_v26  ;;  %v645_v32 = vadd.f32 %v644_v25, %v633_v18  ;;  %v699_v63 = vadd.f32 %v698_v45, %v687_v57  ;;  %v702_v35 = vadd.f32 %v701_v39, %v690_v3 }
  0xd4   : > { %v801_v4 = vadd.f32 %v800_v33, %v1942_v59  ;;  %v761_v54 = vmul.f32 %v760_v38, %v591_v30  ;;  %v764_v48 = vmul.f32 %v763_v34, %v591_v30  ;;  %v806_v62 = vmul.f32 %v805_v52, %v591_v30 }
  0xd5   : > { %v646_v10 = vadd.f32 %v642_v44, %v636_v29  ;;  %v647_v0 = vadd.f32 %v645_v32, %v639_v27  ;;  %v814_v57 = vstv %s1081_s11 }
  0xd6   : > { %v762_v15 = vadd.f32 %v761_v54, %v750_v12  ;;  %v765_v53 = vadd.f32 %v764_v48, %v753_v17  ;;  %v807_v38 = vadd.f32 %v806_v62, %v801_v4 }
  0xd7   : > { %v648_v19 = vmul.f32 %v647_v0, %v646_v10 }
  0xd9   : > { %v704_v5 = vmul.f32 %v703_v58, %v648_v19  ;;  %v707_v56 = vmul.f32 %v706_v28, %v648_v19  ;;  %v767_v2 = vmul.f32 %v766_v1, %v648_v19  ;;  %v770_v40 = vmul.f32 %v769_v55, %v648_v19 }
  0xda   : > { %v809_v20 = vmul.f32 %v808_v21, %v648_v19  ;;  %v772_v28 = vstv %s2199_s17 }
  0xdb   : > { %v705_v14 = vadd.f32 %v704_v5, %v693_v60  ;;  %v708_v7 = vadd.f32 %v707_v56, %v696_v46  ;;  %v768_v59 = vadd.f32 %v767_v2, %v756_v50  ;;  %v771_v11 = vadd.f32 %v770_v40, %v759_v51 }
  0xdc   : > { %v810_v6 = vadd.f32 %v809_v20, %v804_v8 }
  0xdd   : > { %v709_v49 = vadd.f32 %v705_v14, %v699_v63  ;;  %v710_v58 = vadd.f32 %v708_v7, %v702_v35 }
  0xdf   : > { %v711_v1 = vmul.f32 %v710_v58, %v709_v49 }
  0xe1   : > { %v773_v34 = vmul.f32 %v772_v28, %v711_v1  ;;  %v776_v9 = vmul.f32 %v775_v47, %v711_v1  ;;  %v812_v30 = vmul.f32 %v811_v13, %v711_v1 }
  0xe3   : > { %v774_v26 = vadd.f32 %v773_v34, %v762_v15  ;;  %v777_v18 = vadd.f32 %v776_v9, %v765_v53  ;;  %v813_v61 = vadd.f32 %v812_v30, %v807_v38 }
  0xe5   : > { %v778_v43 = vadd.f32 %v774_v26, %v768_v59  ;;  %v779_v36 = vadd.f32 %v777_v18, %v771_v11 }
  0xe7   : > { %v780_v3 = vmul.f32 %v779_v36, %v778_v43 }
  0xe9   : > { %v815_v29 = vmul.f32 %v814_v57, %v780_v3 }
  0xeb   : > { %v816_v27 = vadd.f32 %v815_v29, %v810_v6 }
  0xed   : > { %v817_v31 = vadd.f32 %v816_v27, %v813_v61 }
  0xef   : > { %818 = vst [vmem:[%s232_s30] sm:$0x3] %v817_v31 }
  0xf0   : > { %1268 = shalt.err (!%p1265_p8)
}
  0xf1   : > { %s1269_s26 = scalar_lea.hbm %s2230_s22, 32  ;;  %s1273_s25 = scalar_lea.hbm %s2282_s3, 64 }
  0xf2   : > { %p1270_p13 = scmp.ne.s32.totalorder %s2230_s22, %s1269_s26  ;;  %p1274_p12 = scmp.lt.u32.totalorder %s2230_s22, %s2282_s3 }
  0xf3   : > { %p1275_p2 = scmp.lt.u32.totalorder %s1273_s25, %s1269_s26  ;;  %p1277_p5 = scmp.lt.u32.totalorder %s1269_s26, %s2230_s22 }
  0xf4   : > { %p1271_p4 = pnand %p1270_p13, %p2321_p0 }
  0xf5   : > { %p1276_p9 = por %p1275_p2, %p1274_p12 }
  0xf6   : > { %p1272_p10 = pneg %p1271_p4 }
  0xf7   : > { %p1278_p1 = por %p1277_p5, %p1276_p9 }
  0xf9   : > { %p1279_p6 = pnand %p1278_p1, %p1272_p10 }
  0xfb   : > { %1282 = shalt.err (!%p1279_p6)
}
  0xfc   : > { %1116 = dma.vmem_to_hbm [thread:$0]  (%p2321_p0), %s2232_s0, 32, %s2230_s22, %s820_s29  }
  0xfd PF: > { %s2322_s5 = sld [smem:[#allocation18_spill]]  ;;  %s2323_s4 = sld [smem:[#allocation17_spill]] }
  0xfe   : > { %s846_s28 = sand.u32 1, %s1325_s12  }
  0xff   : > { %s847_s2 = scalar_lea.sflag [#allocation4], %s846_s28 }
 0x103   : > { %p2324_p11 = scmp.ne.s32.totalorder %s2322_s5, 0  ;;  %p2325_p7 = scmp.ge.s32.totalorder %s2323_s4, 2 }
 0x105   : > { %p1130_p3 = pnand %p2325_p7, %p2324_p11 }
 0x107   : > { %1320 = dma.done.wait (!%p1130_p3), %s847_s2, 32  }
 0x108   : > { %1322 = vsyncadd (!%p1130_p3), %s847_s2, 4294967264  ;;  %s21_s17 = sadd.s32 1, %s2323_s4   ;;  %s2326_s12 = sld [smem:[#allocation14_spill]] }
 0x109   : > { %p18_p8 = scmp.ge.s32.totalorder %s21_s17, 4   ;;  %s2327_s13 = sld [smem:[#allocation15_spill]] }
 0x10a   : > { %s2328_s14 = sld [smem:[#allocation20_spill]]  ;;  %s2329_s15 = sld [smem:[#allocation16_spill]] }
 0x10b   : > { %s2330_s16 = sld [smem:[#allocation19_spill]]  ;;  %20 = sbr.rel (!%p18_p8) target bundleno = 12 (0xc), region = 89 }
 0x112   :  { %852 = vsyncpa [#allocation3], 1 }
 0x113   :  { %854 = vsyncpa [#allocation3 + $0x1], 1 }
 0x114   :  { %855 = vsyncpa [#allocation4], 1 }
 0x115   :  { %857 = vsyncpa [#allocation4 + $0x1], 1 }
 0x116   :  { %858 = vsyncpa [#allocation5], 1 }
 0x117   :  { %860 = vsyncpa [#allocation5 + $0x1], 1 }
 0x118   :  { %861 = vsyncpa [#allocation8], 1 }

</bundles_post_ra>
